<compile_context>
chip_gen: v5e
topology: v5e:2x2
jax: 0.10.0
libtpu: 0.0.40
codegen_flags: <defaults>
</compile_context>

<pallas_src>
import numpy as np
import jax
import jax.numpy as jnp
from jax.experimental import pallas as pl
from jax.experimental.pallas import tpu as pltpu


# ----------------------------------------------------------------------------
# DDPM schedules (host-side constants, identical formula to the torch version)
# ----------------------------------------------------------------------------
def ddpm_schedules(beta1, beta2, T, is_linear=True):
    assert beta1 < beta2 < 1.0, "beta1 and beta2 must be in (0, 1)"
    t = np.arange(-1, T, dtype=np.float32)
    if is_linear:
        beta_t = (beta2 - beta1) * t / (T - 1) + beta1
    else:
        beta_t = (beta2 - beta1) * np.square(t) / np.max(np.square(t)) + beta1
    beta_t[0] = beta1
    sqrt_beta_t = np.sqrt(beta_t)
    alpha_t = 1.0 - beta_t
    log_alpha_t = np.log(alpha_t)
    alphabar_t = np.exp(np.cumsum(log_alpha_t))
    sqrtab = np.sqrt(alphabar_t)
    oneover_sqrta = 1.0 / np.sqrt(alpha_t)
    sqrtmab = np.sqrt(1.0 - alphabar_t)
    mab_over_sqrtmab_inv = (1.0 - alpha_t) / sqrtmab
    return {
        "alpha_t": alpha_t,
        "oneover_sqrta": oneover_sqrta,
        "sqrt_beta_t": sqrt_beta_t,
        "alphabar_t": alphabar_t,
        "sqrtab": sqrtab,
        "sqrtmab": sqrtmab,
        "mab_over_sqrtmab": mab_over_sqrtmab_inv,
    }


# ----------------------------------------------------------------------------
# Fused Pallas kernel: the ENTIRE sampling loop in one kernel invocation.
#   prologue: cond = (x*(1-mask)) @ W1x + b1        (loop-invariant)
#   per step: eps = MLP(y, cond, tbias[s]);  y <- a_s*y - am_s*eps + z_scaled[s]
# The schedule scalars (a_s, am_s) are baked in as compile-time constants.
# ----------------------------------------------------------------------------
def make_fused_sample_kernel(a_vals, am_vals):
    a_vals = [float(v) for v in a_vals]
    am_vals = [float(v) for v in am_vals]
    n_steps = len(a_vals)

    def kernel(y0_ref, xm_ref, z_ref, tb_ref,
               w1y_ref, w1x_ref, b1_ref,
               w2_ref, b2_ref, w3_ref, b3_ref,
               out_ref):
        # Loop-invariant conditioning term, computed once.
        cond = (jnp.dot(xm_ref[...], w1x_ref[...],
                        preferred_element_type=jnp.float32)
                + b1_ref[...])                                   # (B, H)

        # Hoist weight loads out of the (unrolled) loop.
        w1y = w1y_ref[...]
        w2 = w2_ref[...]
        b2 = b2_ref[...]
        w3 = w3_ref[...]
        b3 = b3_ref[...]

        y = y0_ref[...]                                          # (B, y_dim)
        for s in range(n_steps):                                 # fully unrolled
            tbias = tb_ref[pl.ds(s, 1), :]                       # (1, H) = t_s*W1t
            h1 = jnp.maximum(
                jnp.dot(y, w1y, preferred_element_type=jnp.float32)
                + tbias + cond, 0.0)
            h2 = jnp.maximum(
                jnp.dot(h1, w2, preferred_element_type=jnp.float32) + b2, 0.0)
            eps = jnp.dot(h2, w3, preferred_element_type=jnp.float32) + b3
            # a_s * (y - m_s * eps) + sqrt(beta_s) * z
            #   == a_s*y - (a_s*m_s)*eps + z_scaled[s]
            y = a_vals[s] * y - am_vals[s] * eps + z_ref[s]
        out_ref[...] = y

    return kernel


def fused_sample(a_vals, am_vals, y0, xm, z_scaled, tbias, params7):
    B, y_dim = y0.shape
    kernel = make_fused_sample_kernel(a_vals, am_vals)
    vmem = pl.BlockSpec(memory_space=pltpu.MemorySpace.VMEM)
    return pl.pallas_call(
        kernel,
        out_shape=jax.ShapeDtypeStruct((B, y_dim), jnp.float32),
        in_specs=[vmem] * 11,       # everything fully resident in VMEM
        out_specs=vmem,
    )(y0, xm, z_scaled, tbias, *params7)


# ----------------------------------------------------------------------------
# Input preparation mirroring Model_Cond_Diffusion.forward (guide_w == 0 path):
#   y0 ~ N(0,1); context_mask = 0; z per step (zero when i == 1), pre-scaled
#   by sqrt(beta_t[i]);  a_i = oneover_sqrta[i];  am_i = a_i * mab_over_sqrtmab[i]
# ----------------------------------------------------------------------------
def prepare_sampling_inputs(x_batch, sched, n_T, y_dim, extra_steps, key):
    n_sample = x_batch.shape[0]
    key, k_y = jax.random.split(key)
    y0 = jax.random.normal(k_y, (n_sample, y_dim), dtype=jnp.float32)

    # is_zero path: context mask all zeros; hoist loop-invariant mask multiply.
    context_mask = jnp.zeros((n_sample, 1), dtype=jnp.float32)
    xm = x_batch * (1.0 - context_mask)

    a_vals, am_vals, t_vals = [], [], []
    z_list = []
    for i_dummy in range(n_T, -extra_steps, -1):
        i = max(i_dummy, 1)
        a_i = float(sched["oneover_sqrta"][i])
        m_i = float(sched["mab_over_sqrtmab"][i])
        s_i = float(sched["sqrt_beta_t"][i])
        a_vals.append(a_i)
        am_vals.append(a_i * m_i)
        t_vals.append(float(i) / float(n_T))
        if i > 1:
            key, k_z = jax.random.split(key)
            z = jax.random.normal(k_z, (n_sample, y_dim), dtype=jnp.float32)
        else:
            z = jnp.zeros((n_sample, y_dim), dtype=jnp.float32)
        z_list.append(s_i * z)                     # pre-scale noise host-side

    t_tbl = jnp.asarray(np.asarray(t_vals, dtype=np.float32))    # (n_steps,)
    z_all = jnp.stack(z_list, axis=0)                            # (n_steps, B, y_dim)
    return a_vals, am_vals, t_tbl, y0, xm, z_all


def model_cond_diffusion_forward(x_batch, params, sched, n_T, y_dim,
                                 extra_steps=8, key=None):
    a_vals, am_vals, t_tbl, y0, xm, z_all = prepare_sampling_inputs(
        x_batch, sched, n_T, y_dim, extra_steps, key)
    w1y, w1x, w1t, b1, w2, b2, w3, b3 = params
    tbias = t_tbl[:, None] * w1t                   # (n_steps, HID) = t_i * W1_t
    params7 = (w1y, w1x, b1, w2, b2, w3, b3)
    return fused_sample(a_vals, am_vals, y0, xm, z_all, tbias, params7)


# ----------------------------------------------------------------------------
# Pure-JAX reference of the same computation (same precomputed inputs)
# ----------------------------------------------------------------------------
def fused_sample_ref(a_vals, am_vals, y0, xm, z_all, tbias, params7):
    w1y, w1x, b1, w2, b2, w3, b3 = params7
    cond = xm @ w1x + b1
    y = y0
    for s in range(len(a_vals)):
        h1 = jnp.maximum(y @ w1y + tbias[s:s + 1, :] + cond, 0.0)
        h2 = jnp.maximum(h1 @ w2 + b2, 0.0)
        eps = h2 @ w3 + b3
        y = a_vals[s] * y - am_vals[s] * eps + z_all[s]
    return y


# ----------------------------------------------------------------------------
# main
# ----------------------------------------------------------------------------
if __name__ == "__main__":
    # Small shapes consistent with the module's forward semantics.
    B = 2          # batch (n_sample)
    X_DIM = 16     # x_dim (conditioning)
    Y_DIM = 8      # y_dim (action / target)
    HID = 32       # hidden width of the denoiser MLP
    N_T = 16       # diffusion timesteps
    EXTRA = 8      # extra_steps in forward()
    BETAS = (1e-4, 0.02)

    sched = ddpm_schedules(BETAS[0], BETAS[1], N_T)

    # Deterministic parameter init (synthetic denoiser nn_model).
    key = jax.random.PRNGKey(0)
    keys = jax.random.split(key, 10)

    def init(k, shape, fan_in):
        return (jax.random.normal(k, shape, dtype=jnp.float32)
                / np.sqrt(float(fan_in)))

    w1y = init(keys[0], (Y_DIM, HID), Y_DIM + X_DIM + 1)
    w1x = init(keys[1], (X_DIM, HID), Y_DIM + X_DIM + 1)
    w1t = init(keys[2], (1, HID), Y_DIM + X_DIM + 1)
    b1 = jnp.zeros((1, HID), dtype=jnp.float32)
    w2 = init(keys[3], (HID, HID), HID)
    b2 = jnp.zeros((1, HID), dtype=jnp.float32)
    w3 = init(keys[4], (HID, Y_DIM), HID)
    b3 = jnp.zeros((1, Y_DIM), dtype=jnp.float32)
    params = (w1y, w1x, w1t, b1, w2, b2, w3, b3)

    # Example conditioning input x_batch: (B, x_dim)
    x_batch = jax.random.normal(keys[5], (B, X_DIM), dtype=jnp.float32)
    rng = keys[6]

    # Build shared inputs once so kernel and reference see identical data.
    a_vals, am_vals, t_tbl, y0, xm, z_all = prepare_sampling_inputs(
        x_batch, sched, N_T, Y_DIM, EXTRA, rng)
    tbias = t_tbl[:, None] * w1t
    params7 = (w1y, w1x, b1, w2, b2, w3, b3)

    y_out = jax.block_until_ready(
        fused_sample(a_vals, am_vals, y0, xm, z_all, tbias, params7))
    y_ref = jax.block_until_ready(
        fused_sample_ref(a_vals, am_vals, y0, xm, z_all, tbias, params7))

    np.testing.assert_allclose(np.asarray(y_out), np.asarray(y_ref),
                               rtol=1e-5, atol=1e-5)
    print("KERNEL_OK")
</pallas_src>

<mosaic_0001>
module attributes {stable_mosaic.version = 11 : i64} {
  func.func @kernel(%arg0: memref<2x8xf32, #tpu.memory_space<vmem>>, %arg1: memref<2x16xf32, #tpu.memory_space<vmem>>, %arg2: memref<24x2x8xf32, #tpu.memory_space<vmem>>, %arg3: memref<24x32xf32, #tpu.memory_space<vmem>>, %arg4: memref<8x32xf32, #tpu.memory_space<vmem>>, %arg5: memref<16x32xf32, #tpu.memory_space<vmem>>, %arg6: memref<1x32xf32, #tpu.memory_space<vmem>>, %arg7: memref<32x32xf32, #tpu.memory_space<vmem>>, %arg8: memref<1x32xf32, #tpu.memory_space<vmem>>, %arg9: memref<32x8xf32, #tpu.memory_space<vmem>>, %arg10: memref<1x8xf32, #tpu.memory_space<vmem>>, %arg11: memref<2x8xf32, #tpu.memory_space<vmem>>) attributes {dimension_semantics = [], scalar_prefetch = 0 : i64, scratch_operands = 0 : i64, tpu.core_type = #tpu.core_type<tc>} {
    %c0 = arith.constant 0 : index
    %c0_0 = arith.constant 0 : index
    %0 = vector.load %arg1[%c0, %c0_0] : memref<2x16xf32, #tpu.memory_space<vmem>>, vector<2x16xf32>
    %c0_1 = arith.constant 0 : index
    %c0_2 = arith.constant 0 : index
    %1 = vector.load %arg5[%c0_1, %c0_2] : memref<16x32xf32, #tpu.memory_space<vmem>>, vector<16x32xf32>
    %cst = arith.constant dense<0.000000e+00> : vector<2x32xf32>
    %2 = tpu.matmul %0, %1, %cst {dimension_numbers = #tpu.dot_dimension_numbers<[1], [0], [0], [1], [0, 0, 1, 1], [], []>} : vector<2x16xf32>, vector<16x32xf32>, vector<2x32xf32> -> vector<2x32xf32>
    %c0_3 = arith.constant 0 : index
    %c0_4 = arith.constant 0 : index
    %3 = vector.load %arg6[%c0_3, %c0_4] : memref<1x32xf32, #tpu.memory_space<vmem>>, vector<1x32xf32>
    %4 = vector.broadcast %3 : vector<1x32xf32> to vector<2x32xf32>
    %5 = arith.addf %2, %4 : vector<2x32xf32>
    %c0_5 = arith.constant 0 : index
    %c0_6 = arith.constant 0 : index
    %6 = vector.load %arg4[%c0_5, %c0_6] : memref<8x32xf32, #tpu.memory_space<vmem>>, vector<8x32xf32>
    %c0_7 = arith.constant 0 : index
    %c0_8 = arith.constant 0 : index
    %7 = vector.load %arg7[%c0_7, %c0_8] : memref<32x32xf32, #tpu.memory_space<vmem>>, vector<32x32xf32>
    %c0_9 = arith.constant 0 : index
    %c0_10 = arith.constant 0 : index
    %8 = vector.load %arg8[%c0_9, %c0_10] : memref<1x32xf32, #tpu.memory_space<vmem>>, vector<1x32xf32>
    %c0_11 = arith.constant 0 : index
    %c0_12 = arith.constant 0 : index
    %9 = vector.load %arg9[%c0_11, %c0_12] : memref<32x8xf32, #tpu.memory_space<vmem>>, vector<32x8xf32>
    %c0_13 = arith.constant 0 : index
    %c0_14 = arith.constant 0 : index
    %10 = vector.load %arg10[%c0_13, %c0_14] : memref<1x8xf32, #tpu.memory_space<vmem>>, vector<1x8xf32>
    %c0_15 = arith.constant 0 : index
    %c0_16 = arith.constant 0 : index
    %11 = vector.load %arg0[%c0_15, %c0_16] : memref<2x8xf32, #tpu.memory_space<vmem>>, vector<2x8xf32>
    %c0_17 = arith.constant 0 : index
    %c0_18 = arith.constant 0 : index
    %12 = vector.load %arg3[%c0_17, %c0_18] : memref<24x32xf32, #tpu.memory_space<vmem>>, vector<1x32xf32>
    %cst_19 = arith.constant dense<0.000000e+00> : vector<2x32xf32>
    %13 = tpu.matmul %11, %6, %cst_19 {dimension_numbers = #tpu.dot_dimension_numbers<[1], [0], [0], [1], [0, 0, 1, 1], [], []>} : vector<2x8xf32>, vector<8x32xf32>, vector<2x32xf32> -> vector<2x32xf32>
    %14 = vector.broadcast %12 : vector<1x32xf32> to vector<2x32xf32>
    %15 = arith.addf %13, %14 : vector<2x32xf32>
    %16 = arith.addf %15, %5 : vector<2x32xf32>
    %cst_20 = arith.constant 0.000000e+00 : f32
    %17 = vector.broadcast %cst_20 : f32 to vector<2x32xf32>
    %18 = arith.maximumf %16, %17 : vector<2x32xf32>
    %cst_21 = arith.constant dense<0.000000e+00> : vector<2x32xf32>
    %19 = tpu.matmul %18, %7, %cst_21 {dimension_numbers = #tpu.dot_dimension_numbers<[1], [0], [0], [1], [0, 0, 1, 1], [], []>} : vector<2x32xf32>, vector<32x32xf32>, vector<2x32xf32> -> vector<2x32xf32>
    %20 = vector.broadcast %8 : vector<1x32xf32> to vector<2x32xf32>
    %21 = arith.addf %19, %20 : vector<2x32xf32>
    %cst_22 = arith.constant 0.000000e+00 : f32
    %22 = vector.broadcast %cst_22 : f32 to vector<2x32xf32>
    %23 = arith.maximumf %21, %22 : vector<2x32xf32>
    %cst_23 = arith.constant dense<0.000000e+00> : vector<2x8xf32>
    %24 = tpu.matmul %23, %9, %cst_23 {dimension_numbers = #tpu.dot_dimension_numbers<[1], [0], [0], [1], [0, 0, 1, 1], [], []>} : vector<2x32xf32>, vector<32x8xf32>, vector<2x8xf32> -> vector<2x8xf32>
    %25 = vector.broadcast %10 : vector<1x8xf32> to vector<2x8xf32>
    %26 = arith.addf %24, %25 : vector<2x8xf32>
    %cst_24 = arith.constant 1.01015246 : f32
    %27 = vector.broadcast %cst_24 : f32 to vector<2x8xf32>
    %28 = arith.mulf %27, %11 : vector<2x8xf32>
    %cst_25 = arith.constant 0.0522381105 : f32
    %29 = vector.broadcast %cst_25 : f32 to vector<2x8xf32>
    %30 = arith.mulf %29, %26 : vector<2x8xf32>
    %31 = arith.subf %28, %30 : vector<2x8xf32>
    %c0_26 = arith.constant 0 : index
    %c0_27 = arith.constant 0 : index
    %c0_28 = arith.constant 0 : index
    %32 = vector.load %arg2[%c0_26, %c0_27, %c0_28] : memref<24x2x8xf32, #tpu.memory_space<vmem>>, vector<1x2x8xf32>
    %33 = vector.shape_cast %32 : vector<1x2x8xf32> to vector<2x8xf32>
    %34 = arith.addf %31, %33 : vector<2x8xf32>
    %c1 = arith.constant 1 : index
    %c0_29 = arith.constant 0 : index
    %35 = vector.load %arg3[%c1, %c0_29] : memref<24x32xf32, #tpu.memory_space<vmem>>, vector<1x32xf32>
    %cst_30 = arith.constant dense<0.000000e+00> : vector<2x32xf32>
    %36 = tpu.matmul %34, %6, %cst_30 {dimension_numbers = #tpu.dot_dimension_numbers<[1], [0], [0], [1], [0, 0, 1, 1], [], []>} : vector<2x8xf32>, vector<8x32xf32>, vector<2x32xf32> -> vector<2x32xf32>
    %37 = vector.broadcast %35 : vector<1x32xf32> to vector<2x32xf32>
    %38 = arith.addf %36, %37 : vector<2x32xf32>
    %39 = arith.addf %38, %5 : vector<2x32xf32>
    %cst_31 = arith.constant 0.000000e+00 : f32
    %40 = vector.broadcast %cst_31 : f32 to vector<2x32xf32>
    %41 = arith.maximumf %39, %40 : vector<2x32xf32>
    %cst_32 = arith.constant dense<0.000000e+00> : vector<2x32xf32>
    %42 = tpu.matmul %41, %7, %cst_32 {dimension_numbers = #tpu.dot_dimension_numbers<[1], [0], [0], [1], [0, 0, 1, 1], [], []>} : vector<2x32xf32>, vector<32x32xf32>, vector<2x32xf32> -> vector<2x32xf32>
    %43 = vector.broadcast %8 : vector<1x32xf32> to vector<2x32xf32>
    %44 = arith.addf %42, %43 : vector<2x32xf32>
    %cst_33 = arith.constant 0.000000e+00 : f32
    %45 = vector.broadcast %cst_33 : f32 to vector<2x32xf32>
    %46 = arith.maximumf %44, %45 : vector<2x32xf32>
    %cst_34 = arith.constant dense<0.000000e+00> : vector<2x8xf32>
    %47 = tpu.matmul %46, %9, %cst_34 {dimension_numbers = #tpu.dot_dimension_numbers<[1], [0], [0], [1], [0, 0, 1, 1], [], []>} : vector<2x32xf32>, vector<32x8xf32>, vector<2x8xf32> -> vector<2x8xf32>
    %48 = vector.broadcast %10 : vector<1x8xf32> to vector<2x8xf32>
    %49 = arith.addf %47, %48 : vector<2x8xf32>
    %cst_35 = arith.constant 1.00946951 : f32
    %50 = vector.broadcast %cst_35 : f32 to vector<2x8xf32>
    %51 = arith.mulf %50, %34 : vector<2x8xf32>
    %cst_36 = arith.constant 0.0518404134 : f32
    %52 = vector.broadcast %cst_36 : f32 to vector<2x8xf32>
    %53 = arith.mulf %52, %49 : vector<2x8xf32>
    %54 = arith.subf %51, %53 : vector<2x8xf32>
    %c1_37 = arith.constant 1 : index
    %c0_38 = arith.constant 0 : index
    %c0_39 = arith.constant 0 : index
    %55 = vector.load %arg2[%c1_37, %c0_38, %c0_39] : memref<24x2x8xf32, #tpu.memory_space<vmem>>, vector<1x2x8xf32>
    %56 = vector.shape_cast %55 : vector<1x2x8xf32> to vector<2x8xf32>
    %57 = arith.addf %54, %56 : vector<2x8xf32>
    %c2 = arith.constant 2 : index
    %c0_40 = arith.constant 0 : index
    %58 = vector.load %arg3[%c2, %c0_40] : memref<24x32xf32, #tpu.memory_space<vmem>>, vector<1x32xf32>
    %cst_41 = arith.constant dense<0.000000e+00> : vector<2x32xf32>
    %59 = tpu.matmul %57, %6, %cst_41 {dimension_numbers = #tpu.dot_dimension_numbers<[1], [0], [0], [1], [0, 0, 1, 1], [], []>} : vector<2x8xf32>, vector<8x32xf32>, vector<2x32xf32> -> vector<2x32xf32>
    %60 = vector.broadcast %58 : vector<1x32xf32> to vector<2x32xf32>
    %61 = arith.addf %59, %60 : vector<2x32xf32>
    %62 = arith.addf %61, %5 : vector<2x32xf32>
    %cst_42 = arith.constant 0.000000e+00 : f32
    %63 = vector.broadcast %cst_42 : f32 to vector<2x32xf32>
    %64 = arith.maximumf %62, %63 : vector<2x32xf32>
    %cst_43 = arith.constant dense<0.000000e+00> : vector<2x32xf32>
    %65 = tpu.matmul %64, %7, %cst_43 {dimension_numbers = #tpu.dot_dimension_numbers<[1], [0], [0], [1], [0, 0, 1, 1], [], []>} : vector<2x32xf32>, vector<32x32xf32>, vector<2x32xf32> -> vector<2x32xf32>
    %66 = vector.broadcast %8 : vector<1x32xf32> to vector<2x32xf32>
    %67 = arith.addf %65, %66 : vector<2x32xf32>
    %cst_44 = arith.constant 0.000000e+00 : f32
    %68 = vector.broadcast %cst_44 : f32 to vector<2x32xf32>
    %69 = arith.maximumf %67, %68 : vector<2x32xf32>
    %cst_45 = arith.constant dense<0.000000e+00> : vector<2x8xf32>
    %70 = tpu.matmul %69, %9, %cst_45 {dimension_numbers = #tpu.dot_dimension_numbers<[1], [0], [0], [1], [0, 0, 1, 1], [], []>} : vector<2x32xf32>, vector<32x8xf32>, vector<2x8xf32> -> vector<2x8xf32>
    %71 = vector.broadcast %10 : vector<1x8xf32> to vector<2x8xf32>
    %72 = arith.addf %70, %71 : vector<2x8xf32>
    %cst_46 = arith.constant 1.00878787 : f32
    %73 = vector.broadcast %cst_46 : f32 to vector<2x8xf32>
    %74 = arith.mulf %73, %57 : vector<2x8xf32>
    %cst_47 = arith.constant 0.0514443219 : f32
    %75 = vector.broadcast %cst_47 : f32 to vector<2x8xf32>
    %76 = arith.mulf %75, %72 : vector<2x8xf32>
    %77 = arith.subf %74, %76 : vector<2x8xf32>
    %c2_48 = arith.constant 2 : index
    %c0_49 = arith.constant 0 : index
    %c0_50 = arith.constant 0 : index
    %78 = vector.load %arg2[%c2_48, %c0_49, %c0_50] : memref<24x2x8xf32, #tpu.memory_space<vmem>>, vector<1x2x8xf32>
    %79 = vector.shape_cast %78 : vector<1x2x8xf32> to vector<2x8xf32>
    %80 = arith.addf %77, %79 : vector<2x8xf32>
    %c3 = arith.constant 3 : index
    %c0_51 = arith.constant 0 : index
    %81 = vector.load %arg3[%c3, %c0_51] : memref<24x32xf32, #tpu.memory_space<vmem>>, vector<1x32xf32>
    %cst_52 = arith.constant dense<0.000000e+00> : vector<2x32xf32>
    %82 = tpu.matmul %80, %6, %cst_52 {dimension_numbers = #tpu.dot_dimension_numbers<[1], [0], [0], [1], [0, 0, 1, 1], [], []>} : vector<2x8xf32>, vector<8x32xf32>, vector<2x32xf32> -> vector<2x32xf32>
    %83 = vector.broadcast %81 : vector<1x32xf32> to vector<2x32xf32>
    %84 = arith.addf %82, %83 : vector<2x32xf32>
    %85 = arith.addf %84, %5 : vector<2x32xf32>
    %cst_53 = arith.constant 0.000000e+00 : f32
    %86 = vector.broadcast %cst_53 : f32 to vector<2x32xf32>
    %87 = arith.maximumf %85, %86 : vector<2x32xf32>
    %cst_54 = arith.constant dense<0.000000e+00> : vector<2x32xf32>
    %88 = tpu.matmul %87, %7, %cst_54 {dimension_numbers = #tpu.dot_dimension_numbers<[1], [0], [0], [1], [0, 0, 1, 1], [], []>} : vector<2x32xf32>, vector<32x32xf32>, vector<2x32xf32> -> vector<2x32xf32>
    %89 = vector.broadcast %8 : vector<1x32xf32> to vector<2x32xf32>
    %90 = arith.addf %88, %89 : vector<2x32xf32>
    %cst_55 = arith.constant 0.000000e+00 : f32
    %91 = vector.broadcast %cst_55 : f32 to vector<2x32xf32>
    %92 = arith.maximumf %90, %91 : vector<2x32xf32>
    %cst_56 = arith.constant dense<0.000000e+00> : vector<2x8xf32>
    %93 = tpu.matmul %92, %9, %cst_56 {dimension_numbers = #tpu.dot_dimension_numbers<[1], [0], [0], [1], [0, 0, 1, 1], [], []>} : vector<2x32xf32>, vector<32x8xf32>, vector<2x8xf32> -> vector<2x8xf32>
    %94 = vector.broadcast %10 : vector<1x8xf32> to vector<2x8xf32>
    %95 = arith.addf %93, %94 : vector<2x8xf32>
    %cst_57 = arith.constant 1.00810754 : f32
    %96 = vector.broadcast %cst_57 : f32 to vector<2x8xf32>
    %97 = arith.mulf %96, %80 : vector<2x8xf32>
    %cst_58 = arith.constant 0.0510458872 : f32
    %98 = vector.broadcast %cst_58 : f32 to vector<2x8xf32>
    %99 = arith.mulf %98, %95 : vector<2x8xf32>
    %100 = arith.subf %97, %99 : vector<2x8xf32>
    %c3_59 = arith.constant 3 : index
    %c0_60 = arith.constant 0 : index
    %c0_61 = arith.constant 0 : index
    %101 = vector.load %arg2[%c3_59, %c0_60, %c0_61] : memref<24x2x8xf32, #tpu.memory_space<vmem>>, vector<1x2x8xf32>
    %102 = vector.shape_cast %101 : vector<1x2x8xf32> to vector<2x8xf32>
    %103 = arith.addf %100, %102 : vector<2x8xf32>
    %c4 = arith.constant 4 : index
    %c0_62 = arith.constant 0 : index
    %104 = vector.load %arg3[%c4, %c0_62] : memref<24x32xf32, #tpu.memory_space<vmem>>, vector<1x32xf32>
    %cst_63 = arith.constant dense<0.000000e+00> : vector<2x32xf32>
    %105 = tpu.matmul %103, %6, %cst_63 {dimension_numbers = #tpu.dot_dimension_numbers<[1], [0], [0], [1], [0, 0, 1, 1], [], []>} : vector<2x8xf32>, vector<8x32xf32>, vector<2x32xf32> -> vector<2x32xf32>
    %106 = vector.broadcast %104 : vector<1x32xf32> to vector<2x32xf32>
    %107 = arith.addf %105, %106 : vector<2x32xf32>
    %108 = arith.addf %107, %5 : vector<2x32xf32>
    %cst_64 = arith.constant 0.000000e+00 : f32
    %109 = vector.broadcast %cst_64 : f32 to vector<2x32xf32>
    %110 = arith.maximumf %108, %109 : vector<2x32xf32>
    %cst_65 = arith.constant dense<0.000000e+00> : vector<2x32xf32>
    %111 = tpu.matmul %110, %7, %cst_65 {dimension_numbers = #tpu.dot_dimension_numbers<[1], [0], [0], [1], [0, 0, 1, 1], [], []>} : vector<2x32xf32>, vector<32x32xf32>, vector<2x32xf32> -> vector<2x32xf32>
    %112 = vector.broadcast %8 : vector<1x32xf32> to vector<2x32xf32>
    %113 = arith.addf %111, %112 : vector<2x32xf32>
    %cst_66 = arith.constant 0.000000e+00 : f32
    %114 = vector.broadcast %cst_66 : f32 to vector<2x32xf32>
    %115 = arith.maximumf %113, %114 : vector<2x32xf32>
    %cst_67 = arith.constant dense<0.000000e+00> : vector<2x8xf32>
    %116 = tpu.matmul %115, %9, %cst_67 {dimension_numbers = #tpu.dot_dimension_numbers<[1], [0], [0], [1], [0, 0, 1, 1], [], []>} : vector<2x32xf32>, vector<32x8xf32>, vector<2x8xf32> -> vector<2x8xf32>
    %117 = vector.broadcast %10 : vector<1x8xf32> to vector<2x8xf32>
    %118 = arith.addf %116, %117 : vector<2x8xf32>
    %cst_68 = arith.constant 1.00742865 : f32
    %119 = vector.broadcast %cst_68 : f32 to vector<2x8xf32>
    %120 = arith.mulf %119, %103 : vector<2x8xf32>
    %cst_69 = arith.constant 0.0506396964 : f32
    %121 = vector.broadcast %cst_69 : f32 to vector<2x8xf32>
    %122 = arith.mulf %121, %118 : vector<2x8xf32>
    %123 = arith.subf %120, %122 : vector<2x8xf32>
    %c4_70 = arith.constant 4 : index
    %c0_71 = arith.constant 0 : index
    %c0_72 = arith.constant 0 : index
    %124 = vector.load %arg2[%c4_70, %c0_71, %c0_72] : memref<24x2x8xf32, #tpu.memory_space<vmem>>, vector<1x2x8xf32>
    %125 = vector.shape_cast %124 : vector<1x2x8xf32> to vector<2x8xf32>
    %126 = arith.addf %123, %125 : vector<2x8xf32>
    %c5 = arith.constant 5 : index
    %c0_73 = arith.constant 0 : index
    %127 = vector.load %arg3[%c5, %c0_73] : memref<24x32xf32, #tpu.memory_space<vmem>>, vector<1x32xf32>
    %cst_74 = arith.constant dense<0.000000e+00> : vector<2x32xf32>
    %128 = tpu.matmul %126, %6, %cst_74 {dimension_numbers = #tpu.dot_dimension_numbers<[1], [0], [0], [1], [0, 0, 1, 1], [], []>} : vector<2x8xf32>, vector<8x32xf32>, vector<2x32xf32> -> vector<2x32xf32>
    %129 = vector.broadcast %127 : vector<1x32xf32> to vector<2x32xf32>
    %130 = arith.addf %128, %129 : vector<2x32xf32>
    %131 = arith.addf %130, %5 : vector<2x32xf32>
    %cst_75 = arith.constant 0.000000e+00 : f32
    %132 = vector.broadcast %cst_75 : f32 to vector<2x32xf32>
    %133 = arith.maximumf %131, %132 : vector<2x32xf32>
    %cst_76 = arith.constant dense<0.000000e+00> : vector<2x32xf32>
    %134 = tpu.matmul %133, %7, %cst_76 {dimension_numbers = #tpu.dot_dimension_numbers<[1], [0], [0], [1], [0, 0, 1, 1], [], []>} : vector<2x32xf32>, vector<32x32xf32>, vector<2x32xf32> -> vector<2x32xf32>
    %135 = vector.broadcast %8 : vector<1x32xf32> to vector<2x32xf32>
    %136 = arith.addf %134, %135 : vector<2x32xf32>
    %cst_77 = arith.constant 0.000000e+00 : f32
    %137 = vector.broadcast %cst_77 : f32 to vector<2x32xf32>
    %138 = arith.maximumf %136, %137 : vector<2x32xf32>
    %cst_78 = arith.constant dense<0.000000e+00> : vector<2x8xf32>
    %139 = tpu.matmul %138, %9, %cst_78 {dimension_numbers = #tpu.dot_dimension_numbers<[1], [0], [0], [1], [0, 0, 1, 1], [], []>} : vector<2x32xf32>, vector<32x8xf32>, vector<2x8xf32> -> vector<2x8xf32>
    %140 = vector.broadcast %10 : vector<1x8xf32> to vector<2x8xf32>
    %141 = arith.addf %139, %140 : vector<2x8xf32>
    %cst_79 = arith.constant 1.00675106 : f32
    %142 = vector.broadcast %cst_79 : f32 to vector<2x8xf32>
    %143 = arith.mulf %142, %126 : vector<2x8xf32>
    %cst_80 = arith.constant 0.0502182506 : f32
    %144 = vector.broadcast %cst_80 : f32 to vector<2x8xf32>
    %145 = arith.mulf %144, %141 : vector<2x8xf32>
    %146 = arith.subf %143, %145 : vector<2x8xf32>
    %c5_81 = arith.constant 5 : index
    %c0_82 = arith.constant 0 : index
    %c0_83 = arith.constant 0 : index
    %147 = vector.load %arg2[%c5_81, %c0_82, %c0_83] : memref<24x2x8xf32, #tpu.memory_space<vmem>>, vector<1x2x8xf32>
    %148 = vector.shape_cast %147 : vector<1x2x8xf32> to vector<2x8xf32>
    %149 = arith.addf %146, %148 : vector<2x8xf32>
    %c6 = arith.constant 6 : index
    %c0_84 = arith.constant 0 : index
    %150 = vector.load %arg3[%c6, %c0_84] : memref<24x32xf32, #tpu.memory_space<vmem>>, vector<1x32xf32>
    %cst_85 = arith.constant dense<0.000000e+00> : vector<2x32xf32>
    %151 = tpu.matmul %149, %6, %cst_85 {dimension_numbers = #tpu.dot_dimension_numbers<[1], [0], [0], [1], [0, 0, 1, 1], [], []>} : vector<2x8xf32>, vector<8x32xf32>, vector<2x32xf32> -> vector<2x32xf32>
    %152 = vector.broadcast %150 : vector<1x32xf32> to vector<2x32xf32>
    %153 = arith.addf %151, %152 : vector<2x32xf32>
    %154 = arith.addf %153, %5 : vector<2x32xf32>
    %cst_86 = arith.constant 0.000000e+00 : f32
    %155 = vector.broadcast %cst_86 : f32 to vector<2x32xf32>
    %156 = arith.maximumf %154, %155 : vector<2x32xf32>
    %cst_87 = arith.constant dense<0.000000e+00> : vector<2x32xf32>
    %157 = tpu.matmul %156, %7, %cst_87 {dimension_numbers = #tpu.dot_dimension_numbers<[1], [0], [0], [1], [0, 0, 1, 1], [], []>} : vector<2x32xf32>, vector<32x32xf32>, vector<2x32xf32> -> vector<2x32xf32>
    %158 = vector.broadcast %8 : vector<1x32xf32> to vector<2x32xf32>
    %159 = arith.addf %157, %158 : vector<2x32xf32>
    %cst_88 = arith.constant 0.000000e+00 : f32
    %160 = vector.broadcast %cst_88 : f32 to vector<2x32xf32>
    %161 = arith.maximumf %159, %160 : vector<2x32xf32>
    %cst_89 = arith.constant dense<0.000000e+00> : vector<2x8xf32>
    %162 = tpu.matmul %161, %9, %cst_89 {dimension_numbers = #tpu.dot_dimension_numbers<[1], [0], [0], [1], [0, 0, 1, 1], [], []>} : vector<2x32xf32>, vector<32x8xf32>, vector<2x8xf32> -> vector<2x8xf32>
    %163 = vector.broadcast %10 : vector<1x8xf32> to vector<2x8xf32>
    %164 = arith.addf %162, %163 : vector<2x8xf32>
    %cst_90 = arith.constant 1.00607491 : f32
    %165 = vector.broadcast %cst_90 : f32 to vector<2x8xf32>
    %166 = arith.mulf %165, %149 : vector<2x8xf32>
    %cst_91 = arith.constant 0.0497714095 : f32
    %167 = vector.broadcast %cst_91 : f32 to vector<2x8xf32>
    %168 = arith.mulf %167, %164 : vector<2x8xf32>
    %169 = arith.subf %166, %168 : vector<2x8xf32>
    %c6_92 = arith.constant 6 : index
    %c0_93 = arith.constant 0 : index
    %c0_94 = arith.constant 0 : index
    %170 = vector.load %arg2[%c6_92, %c0_93, %c0_94] : memref<24x2x8xf32, #tpu.memory_space<vmem>>, vector<1x2x8xf32>
    %171 = vector.shape_cast %170 : vector<1x2x8xf32> to vector<2x8xf32>
    %172 = arith.addf %169, %171 : vector<2x8xf32>
    %c7 = arith.constant 7 : index
    %c0_95 = arith.constant 0 : index
    %173 = vector.load %arg3[%c7, %c0_95] : memref<24x32xf32, #tpu.memory_space<vmem>>, vector<1x32xf32>
    %cst_96 = arith.constant dense<0.000000e+00> : vector<2x32xf32>
    %174 = tpu.matmul %172, %6, %cst_96 {dimension_numbers = #tpu.dot_dimension_numbers<[1], [0], [0], [1], [0, 0, 1, 1], [], []>} : vector<2x8xf32>, vector<8x32xf32>, vector<2x32xf32> -> vector<2x32xf32>
    %175 = vector.broadcast %173 : vector<1x32xf32> to vector<2x32xf32>
    %176 = arith.addf %174, %175 : vector<2x32xf32>
    %177 = arith.addf %176, %5 : vector<2x32xf32>
    %cst_97 = arith.constant 0.000000e+00 : f32
    %178 = vector.broadcast %cst_97 : f32 to vector<2x32xf32>
    %179 = arith.maximumf %177, %178 : vector<2x32xf32>
    %cst_98 = arith.constant dense<0.000000e+00> : vector<2x32xf32>
    %180 = tpu.matmul %179, %7, %cst_98 {dimension_numbers = #tpu.dot_dimension_numbers<[1], [0], [0], [1], [0, 0, 1, 1], [], []>} : vector<2x32xf32>, vector<32x32xf32>, vector<2x32xf32> -> vector<2x32xf32>
    %181 = vector.broadcast %8 : vector<1x32xf32> to vector<2x32xf32>
    %182 = arith.addf %180, %181 : vector<2x32xf32>
    %cst_99 = arith.constant 0.000000e+00 : f32
    %183 = vector.broadcast %cst_99 : f32 to vector<2x32xf32>
    %184 = arith.maximumf %182, %183 : vector<2x32xf32>
    %cst_100 = arith.constant dense<0.000000e+00> : vector<2x8xf32>
    %185 = tpu.matmul %184, %9, %cst_100 {dimension_numbers = #tpu.dot_dimension_numbers<[1], [0], [0], [1], [0, 0, 1, 1], [], []>} : vector<2x32xf32>, vector<32x8xf32>, vector<2x8xf32> -> vector<2x8xf32>
    %186 = vector.broadcast %10 : vector<1x8xf32> to vector<2x8xf32>
    %187 = arith.addf %185, %186 : vector<2x8xf32>
    %cst_101 = arith.constant 1.00540006 : f32
    %188 = vector.broadcast %cst_101 : f32 to vector<2x8xf32>
    %189 = arith.mulf %188, %172 : vector<2x8xf32>
    %cst_102 = arith.constant 0.0492833406 : f32
    %190 = vector.broadcast %cst_102 : f32 to vector<2x8xf32>
    %191 = arith.mulf %190, %187 : vector<2x8xf32>
    %192 = arith.subf %189, %191 : vector<2x8xf32>
    %c7_103 = arith.constant 7 : index
    %c0_104 = arith.constant 0 : index
    %c0_105 = arith.constant 0 : index
    %193 = vector.load %arg2[%c7_103, %c0_104, %c0_105] : memref<24x2x8xf32, #tpu.memory_space<vmem>>, vector<1x2x8xf32>
    %194 = vector.shape_cast %193 : vector<1x2x8xf32> to vector<2x8xf32>
    %195 = arith.addf %192, %194 : vector<2x8xf32>
    %c8 = arith.constant 8 : index
    %c0_106 = arith.constant 0 : index
    %196 = vector.load %arg3[%c8, %c0_106] : memref<24x32xf32, #tpu.memory_space<vmem>>, vector<1x32xf32>
    %cst_107 = arith.constant dense<0.000000e+00> : vector<2x32xf32>
    %197 = tpu.matmul %195, %6, %cst_107 {dimension_numbers = #tpu.dot_dimension_numbers<[1], [0], [0], [1], [0, 0, 1, 1], [], []>} : vector<2x8xf32>, vector<8x32xf32>, vector<2x32xf32> -> vector<2x32xf32>
    %198 = vector.broadcast %196 : vector<1x32xf32> to vector<2x32xf32>
    %199 = arith.addf %197, %198 : vector<2x32xf32>
    %200 = arith.addf %199, %5 : vector<2x32xf32>
    %cst_108 = arith.constant 0.000000e+00 : f32
    %201 = vector.broadcast %cst_108 : f32 to vector<2x32xf32>
    %202 = arith.maximumf %200, %201 : vector<2x32xf32>
    %cst_109 = arith.constant dense<0.000000e+00> : vector<2x32xf32>
    %203 = tpu.matmul %202, %7, %cst_109 {dimension_numbers = #tpu.dot_dimension_numbers<[1], [0], [0], [1], [0, 0, 1, 1], [], []>} : vector<2x32xf32>, vector<32x32xf32>, vector<2x32xf32> -> vector<2x32xf32>
    %204 = vector.broadcast %8 : vector<1x32xf32> to vector<2x32xf32>
    %205 = arith.addf %203, %204 : vector<2x32xf32>
    %cst_110 = arith.constant 0.000000e+00 : f32
    %206 = vector.broadcast %cst_110 : f32 to vector<2x32xf32>
    %207 = arith.maximumf %205, %206 : vector<2x32xf32>
    %cst_111 = arith.constant dense<0.000000e+00> : vector<2x8xf32>
    %208 = tpu.matmul %207, %9, %cst_111 {dimension_numbers = #tpu.dot_dimension_numbers<[1], [0], [0], [1], [0, 0, 1, 1], [], []>} : vector<2x32xf32>, vector<32x8xf32>, vector<2x8xf32> -> vector<2x8xf32>
    %209 = vector.broadcast %10 : vector<1x8xf32> to vector<2x8xf32>
    %210 = arith.addf %208, %209 : vector<2x8xf32>
    %cst_112 = arith.constant 1.00472665 : f32
    %211 = vector.broadcast %cst_112 : f32 to vector<2x8xf32>
    %212 = arith.mulf %211, %195 : vector<2x8xf32>
    %cst_113 = arith.constant 4.873100e-02 : f32
    %213 = vector.broadcast %cst_113 : f32 to vector<2x8xf32>
    %214 = arith.mulf %213, %210 : vector<2x8xf32>
    %215 = arith.subf %212, %214 : vector<2x8xf32>
    %c8_114 = arith.constant 8 : index
    %c0_115 = arith.constant 0 : index
    %c0_116 = arith.constant 0 : index
    %216 = vector.load %arg2[%c8_114, %c0_115, %c0_116] : memref<24x2x8xf32, #tpu.memory_space<vmem>>, vector<1x2x8xf32>
    %217 = vector.shape_cast %216 : vector<1x2x8xf32> to vector<2x8xf32>
    %218 = arith.addf %215, %217 : vector<2x8xf32>
    %c9 = arith.constant 9 : index
    %c0_117 = arith.constant 0 : index
    %219 = vector.load %arg3[%c9, %c0_117] : memref<24x32xf32, #tpu.memory_space<vmem>>, vector<1x32xf32>
    %cst_118 = arith.constant dense<0.000000e+00> : vector<2x32xf32>
    %220 = tpu.matmul %218, %6, %cst_118 {dimension_numbers = #tpu.dot_dimension_numbers<[1], [0], [0], [1], [0, 0, 1, 1], [], []>} : vector<2x8xf32>, vector<8x32xf32>, vector<2x32xf32> -> vector<2x32xf32>
    %221 = vector.broadcast %219 : vector<1x32xf32> to vector<2x32xf32>
    %222 = arith.addf %220, %221 : vector<2x32xf32>
    %223 = arith.addf %222, %5 : vector<2x32xf32>
    %cst_119 = arith.constant 0.000000e+00 : f32
    %224 = vector.broadcast %cst_119 : f32 to vector<2x32xf32>
    %225 = arith.maximumf %223, %224 : vector<2x32xf32>
    %cst_120 = arith.constant dense<0.000000e+00> : vector<2x32xf32>
    %226 = tpu.matmul %225, %7, %cst_120 {dimension_numbers = #tpu.dot_dimension_numbers<[1], [0], [0], [1], [0, 0, 1, 1], [], []>} : vector<2x32xf32>, vector<32x32xf32>, vector<2x32xf32> -> vector<2x32xf32>
    %227 = vector.broadcast %8 : vector<1x32xf32> to vector<2x32xf32>
    %228 = arith.addf %226, %227 : vector<2x32xf32>
    %cst_121 = arith.constant 0.000000e+00 : f32
    %229 = vector.broadcast %cst_121 : f32 to vector<2x32xf32>
    %230 = arith.maximumf %228, %229 : vector<2x32xf32>
    %cst_122 = arith.constant dense<0.000000e+00> : vector<2x8xf32>
    %231 = tpu.matmul %230, %9, %cst_122 {dimension_numbers = #tpu.dot_dimension_numbers<[1], [0], [0], [1], [0, 0, 1, 1], [], []>} : vector<2x32xf32>, vector<32x8xf32>, vector<2x8xf32> -> vector<2x8xf32>
    %232 = vector.broadcast %10 : vector<1x8xf32> to vector<2x8xf32>
    %233 = arith.addf %231, %232 : vector<2x8xf32>
    %cst_123 = arith.constant 1.00405455 : f32
    %234 = vector.broadcast %cst_123 : f32 to vector<2x8xf32>
    %235 = arith.mulf %234, %218 : vector<2x8xf32>
    %cst_124 = arith.constant 0.0480769202 : f32
    %236 = vector.broadcast %cst_124 : f32 to vector<2x8xf32>
    %237 = arith.mulf %236, %233 : vector<2x8xf32>
    %238 = arith.subf %235, %237 : vector<2x8xf32>
    %c9_125 = arith.constant 9 : index
    %c0_126 = arith.constant 0 : index
    %c0_127 = arith.constant 0 : index
    %239 = vector.load %arg2[%c9_125, %c0_126, %c0_127] : memref<24x2x8xf32, #tpu.memory_space<vmem>>, vector<1x2x8xf32>
    %240 = vector.shape_cast %239 : vector<1x2x8xf32> to vector<2x8xf32>
    %241 = arith.addf %238, %240 : vector<2x8xf32>
    %c10 = arith.constant 10 : index
    %c0_128 = arith.constant 0 : index
    %242 = vector.load %arg3[%c10, %c0_128] : memref<24x32xf32, #tpu.memory_space<vmem>>, vector<1x32xf32>
    %cst_129 = arith.constant dense<0.000000e+00> : vector<2x32xf32>
    %243 = tpu.matmul %241, %6, %cst_129 {dimension_numbers = #tpu.dot_dimension_numbers<[1], [0], [0], [1], [0, 0, 1, 1], [], []>} : vector<2x8xf32>, vector<8x32xf32>, vector<2x32xf32> -> vector<2x32xf32>
    %244 = vector.broadcast %242 : vector<1x32xf32> to vector<2x32xf32>
    %245 = arith.addf %243, %244 : vector<2x32xf32>
    %246 = arith.addf %245, %5 : vector<2x32xf32>
    %cst_130 = arith.constant 0.000000e+00 : f32
    %247 = vector.broadcast %cst_130 : f32 to vector<2x32xf32>
    %248 = arith.maximumf %246, %247 : vector<2x32xf32>
    %cst_131 = arith.constant dense<0.000000e+00> : vector<2x32xf32>
    %249 = tpu.matmul %248, %7, %cst_131 {dimension_numbers = #tpu.dot_dimension_numbers<[1], [0], [0], [1], [0, 0, 1, 1], [], []>} : vector<2x32xf32>, vector<32x32xf32>, vector<2x32xf32> -> vector<2x32xf32>
    %250 = vector.broadcast %8 : vector<1x32xf32> to vector<2x32xf32>
    %251 = arith.addf %249, %250 : vector<2x32xf32>
    %cst_132 = arith.constant 0.000000e+00 : f32
    %252 = vector.broadcast %cst_132 : f32 to vector<2x32xf32>
    %253 = arith.maximumf %251, %252 : vector<2x32xf32>
    %cst_133 = arith.constant dense<0.000000e+00> : vector<2x8xf32>
    %254 = tpu.matmul %253, %9, %cst_133 {dimension_numbers = #tpu.dot_dimension_numbers<[1], [0], [0], [1], [0, 0, 1, 1], [], []>} : vector<2x32xf32>, vector<32x8xf32>, vector<2x8xf32> -> vector<2x8xf32>
    %255 = vector.broadcast %10 : vector<1x8xf32> to vector<2x8xf32>
    %256 = arith.addf %254, %255 : vector<2x8xf32>
    %cst_134 = arith.constant 1.00338376 : f32
    %257 = vector.broadcast %cst_134 : f32 to vector<2x8xf32>
    %258 = arith.mulf %257, %241 : vector<2x8xf32>
    %cst_135 = arith.constant 0.0472574048 : f32
    %259 = vector.broadcast %cst_135 : f32 to vector<2x8xf32>
    %260 = arith.mulf %259, %256 : vector<2x8xf32>
    %261 = arith.subf %258, %260 : vector<2x8xf32>
    %c10_136 = arith.constant 10 : index
    %c0_137 = arith.constant 0 : index
    %c0_138 = arith.constant 0 : index
    %262 = vector.load %arg2[%c10_136, %c0_137, %c0_138] : memref<24x2x8xf32, #tpu.memory_space<vmem>>, vector<1x2x8xf32>
    %263 = vector.shape_cast %262 : vector<1x2x8xf32> to vector<2x8xf32>
    %264 = arith.addf %261, %263 : vector<2x8xf32>
    %c11 = arith.constant 11 : index
    %c0_139 = arith.constant 0 : index
    %265 = vector.load %arg3[%c11, %c0_139] : memref<24x32xf32, #tpu.memory_space<vmem>>, vector<1x32xf32>
    %cst_140 = arith.constant dense<0.000000e+00> : vector<2x32xf32>
    %266 = tpu.matmul %264, %6, %cst_140 {dimension_numbers = #tpu.dot_dimension_numbers<[1], [0], [0], [1], [0, 0, 1, 1], [], []>} : vector<2x8xf32>, vector<8x32xf32>, vector<2x32xf32> -> vector<2x32xf32>
    %267 = vector.broadcast %265 : vector<1x32xf32> to vector<2x32xf32>
    %268 = arith.addf %266, %267 : vector<2x32xf32>
    %269 = arith.addf %268, %5 : vector<2x32xf32>
    %cst_141 = arith.constant 0.000000e+00 : f32
    %270 = vector.broadcast %cst_141 : f32 to vector<2x32xf32>
    %271 = arith.maximumf %269, %270 : vector<2x32xf32>
    %cst_142 = arith.constant dense<0.000000e+00> : vector<2x32xf32>
    %272 = tpu.matmul %271, %7, %cst_142 {dimension_numbers = #tpu.dot_dimension_numbers<[1], [0], [0], [1], [0, 0, 1, 1], [], []>} : vector<2x32xf32>, vector<32x32xf32>, vector<2x32xf32> -> vector<2x32xf32>
    %273 = vector.broadcast %8 : vector<1x32xf32> to vector<2x32xf32>
    %274 = arith.addf %272, %273 : vector<2x32xf32>
    %cst_143 = arith.constant 0.000000e+00 : f32
    %275 = vector.broadcast %cst_143 : f32 to vector<2x32xf32>
    %276 = arith.maximumf %274, %275 : vector<2x32xf32>
    %cst_144 = arith.constant dense<0.000000e+00> : vector<2x8xf32>
    %277 = tpu.matmul %276, %9, %cst_144 {dimension_numbers = #tpu.dot_dimension_numbers<[1], [0], [0], [1], [0, 0, 1, 1], [], []>} : vector<2x32xf32>, vector<32x8xf32>, vector<2x8xf32> -> vector<2x8xf32>
    %278 = vector.broadcast %10 : vector<1x8xf32> to vector<2x8xf32>
    %279 = arith.addf %277, %278 : vector<2x8xf32>
    %cst_145 = arith.constant 1.0027144 : f32
    %280 = vector.broadcast %cst_145 : f32 to vector<2x8xf32>
    %281 = arith.mulf %280, %264 : vector<2x8xf32>
    %cst_146 = arith.constant 0.0461523719 : f32
    %282 = vector.broadcast %cst_146 : f32 to vector<2x8xf32>
    %283 = arith.mulf %282, %279 : vector<2x8xf32>
    %284 = arith.subf %281, %283 : vector<2x8xf32>
    %c11_147 = arith.constant 11 : index
    %c0_148 = arith.constant 0 : index
    %c0_149 = arith.constant 0 : index
    %285 = vector.load %arg2[%c11_147, %c0_148, %c0_149] : memref<24x2x8xf32, #tpu.memory_space<vmem>>, vector<1x2x8xf32>
    %286 = vector.shape_cast %285 : vector<1x2x8xf32> to vector<2x8xf32>
    %287 = arith.addf %284, %286 : vector<2x8xf32>
    %c12 = arith.constant 12 : index
    %c0_150 = arith.constant 0 : index
    %288 = vector.load %arg3[%c12, %c0_150] : memref<24x32xf32, #tpu.memory_space<vmem>>, vector<1x32xf32>
    %cst_151 = arith.constant dense<0.000000e+00> : vector<2x32xf32>
    %289 = tpu.matmul %287, %6, %cst_151 {dimension_numbers = #tpu.dot_dimension_numbers<[1], [0], [0], [1], [0, 0, 1, 1], [], []>} : vector<2x8xf32>, vector<8x32xf32>, vector<2x32xf32> -> vector<2x32xf32>
    %290 = vector.broadcast %288 : vector<1x32xf32> to vector<2x32xf32>
    %291 = arith.addf %289, %290 : vector<2x32xf32>
    %292 = arith.addf %291, %5 : vector<2x32xf32>
    %cst_152 = arith.constant 0.000000e+00 : f32
    %293 = vector.broadcast %cst_152 : f32 to vector<2x32xf32>
    %294 = arith.maximumf %292, %293 : vector<2x32xf32>
    %cst_153 = arith.constant dense<0.000000e+00> : vector<2x32xf32>
    %295 = tpu.matmul %294, %7, %cst_153 {dimension_numbers = #tpu.dot_dimension_numbers<[1], [0], [0], [1], [0, 0, 1, 1], [], []>} : vector<2x32xf32>, vector<32x32xf32>, vector<2x32xf32> -> vector<2x32xf32>
    %296 = vector.broadcast %8 : vector<1x32xf32> to vector<2x32xf32>
    %297 = arith.addf %295, %296 : vector<2x32xf32>
    %cst_154 = arith.constant 0.000000e+00 : f32
    %298 = vector.broadcast %cst_154 : f32 to vector<2x32xf32>
    %299 = arith.maximumf %297, %298 : vector<2x32xf32>
    %cst_155 = arith.constant dense<0.000000e+00> : vector<2x8xf32>
    %300 = tpu.matmul %299, %9, %cst_155 {dimension_numbers = #tpu.dot_dimension_numbers<[1], [0], [0], [1], [0, 0, 1, 1], [], []>} : vector<2x32xf32>, vector<32x8xf32>, vector<2x8xf32> -> vector<2x8xf32>
    %301 = vector.broadcast %10 : vector<1x8xf32> to vector<2x8xf32>
    %302 = arith.addf %300, %301 : vector<2x8xf32>
    %cst_156 = arith.constant 1.00204623 : f32
    %303 = vector.broadcast %cst_156 : f32 to vector<2x8xf32>
    %304 = arith.mulf %303, %287 : vector<2x8xf32>
    %cst_157 = arith.constant 0.044508554 : f32
    %305 = vector.broadcast %cst_157 : f32 to vector<2x8xf32>
    %306 = arith.mulf %305, %302 : vector<2x8xf32>
    %307 = arith.subf %304, %306 : vector<2x8xf32>
    %c12_158 = arith.constant 12 : index
    %c0_159 = arith.constant 0 : index
    %c0_160 = arith.constant 0 : index
    %308 = vector.load %arg2[%c12_158, %c0_159, %c0_160] : memref<24x2x8xf32, #tpu.memory_space<vmem>>, vector<1x2x8xf32>
    %309 = vector.shape_cast %308 : vector<1x2x8xf32> to vector<2x8xf32>
    %310 = arith.addf %307, %309 : vector<2x8xf32>
    %c13 = arith.constant 13 : index
    %c0_161 = arith.constant 0 : index
    %311 = vector.load %arg3[%c13, %c0_161] : memref<24x32xf32, #tpu.memory_space<vmem>>, vector<1x32xf32>
    %cst_162 = arith.constant dense<0.000000e+00> : vector<2x32xf32>
    %312 = tpu.matmul %310, %6, %cst_162 {dimension_numbers = #tpu.dot_dimension_numbers<[1], [0], [0], [1], [0, 0, 1, 1], [], []>} : vector<2x8xf32>, vector<8x32xf32>, vector<2x32xf32> -> vector<2x32xf32>
    %313 = vector.broadcast %311 : vector<1x32xf32> to vector<2x32xf32>
    %314 = arith.addf %312, %313 : vector<2x32xf32>
    %315 = arith.addf %314, %5 : vector<2x32xf32>
    %cst_163 = arith.constant 0.000000e+00 : f32
    %316 = vector.broadcast %cst_163 : f32 to vector<2x32xf32>
    %317 = arith.maximumf %315, %316 : vector<2x32xf32>
    %cst_164 = arith.constant dense<0.000000e+00> : vector<2x32xf32>
    %318 = tpu.matmul %317, %7, %cst_164 {dimension_numbers = #tpu.dot_dimension_numbers<[1], [0], [0], [1], [0, 0, 1, 1], [], []>} : vector<2x32xf32>, vector<32x32xf32>, vector<2x32xf32> -> vector<2x32xf32>
    %319 = vector.broadcast %8 : vector<1x32xf32> to vector<2x32xf32>
    %320 = arith.addf %318, %319 : vector<2x32xf32>
    %cst_165 = arith.constant 0.000000e+00 : f32
    %321 = vector.broadcast %cst_165 : f32 to vector<2x32xf32>
    %322 = arith.maximumf %320, %321 : vector<2x32xf32>
    %cst_166 = arith.constant dense<0.000000e+00> : vector<2x8xf32>
    %323 = tpu.matmul %322, %9, %cst_166 {dimension_numbers = #tpu.dot_dimension_numbers<[1], [0], [0], [1], [0, 0, 1, 1], [], []>} : vector<2x32xf32>, vector<32x8xf32>, vector<2x8xf32> -> vector<2x8xf32>
    %324 = vector.broadcast %10 : vector<1x8xf32> to vector<2x8xf32>
    %325 = arith.addf %323, %324 : vector<2x8xf32>
    %cst_167 = arith.constant 1.00137949 : f32
    %326 = vector.broadcast %cst_167 : f32 to vector<2x8xf32>
    %327 = arith.mulf %326, %310 : vector<2x8xf32>
    %cst_168 = arith.constant 0.0416829102 : f32
    %328 = vector.broadcast %cst_168 : f32 to vector<2x8xf32>
    %329 = arith.mulf %328, %325 : vector<2x8xf32>
    %330 = arith.subf %327, %329 : vector<2x8xf32>
    %c13_169 = arith.constant 13 : index
    %c0_170 = arith.constant 0 : index
    %c0_171 = arith.constant 0 : index
    %331 = vector.load %arg2[%c13_169, %c0_170, %c0_171] : memref<24x2x8xf32, #tpu.memory_space<vmem>>, vector<1x2x8xf32>
    %332 = vector.shape_cast %331 : vector<1x2x8xf32> to vector<2x8xf32>
    %333 = arith.addf %330, %332 : vector<2x8xf32>
    %c14 = arith.constant 14 : index
    %c0_172 = arith.constant 0 : index
    %334 = vector.load %arg3[%c14, %c0_172] : memref<24x32xf32, #tpu.memory_space<vmem>>, vector<1x32xf32>
    %cst_173 = arith.constant dense<0.000000e+00> : vector<2x32xf32>
    %335 = tpu.matmul %333, %6, %cst_173 {dimension_numbers = #tpu.dot_dimension_numbers<[1], [0], [0], [1], [0, 0, 1, 1], [], []>} : vector<2x8xf32>, vector<8x32xf32>, vector<2x32xf32> -> vector<2x32xf32>
    %336 = vector.broadcast %334 : vector<1x32xf32> to vector<2x32xf32>
    %337 = arith.addf %335, %336 : vector<2x32xf32>
    %338 = arith.addf %337, %5 : vector<2x32xf32>
    %cst_174 = arith.constant 0.000000e+00 : f32
    %339 = vector.broadcast %cst_174 : f32 to vector<2x32xf32>
    %340 = arith.maximumf %338, %339 : vector<2x32xf32>
    %cst_175 = arith.constant dense<0.000000e+00> : vector<2x32xf32>
    %341 = tpu.matmul %340, %7, %cst_175 {dimension_numbers = #tpu.dot_dimension_numbers<[1], [0], [0], [1], [0, 0, 1, 1], [], []>} : vector<2x32xf32>, vector<32x32xf32>, vector<2x32xf32> -> vector<2x32xf32>
    %342 = vector.broadcast %8 : vector<1x32xf32> to vector<2x32xf32>
    %343 = arith.addf %341, %342 : vector<2x32xf32>
    %cst_176 = arith.constant 0.000000e+00 : f32
    %344 = vector.broadcast %cst_176 : f32 to vector<2x32xf32>
    %345 = arith.maximumf %343, %344 : vector<2x32xf32>
    %cst_177 = arith.constant dense<0.000000e+00> : vector<2x8xf32>
    %346 = tpu.matmul %345, %9, %cst_177 {dimension_numbers = #tpu.dot_dimension_numbers<[1], [0], [0], [1], [0, 0, 1, 1], [], []>} : vector<2x32xf32>, vector<32x8xf32>, vector<2x8xf32> -> vector<2x8xf32>
    %347 = vector.broadcast %10 : vector<1x8xf32> to vector<2x8xf32>
    %348 = arith.addf %346, %347 : vector<2x8xf32>
    %cst_178 = arith.constant 1.00071406 : f32
    %349 = vector.broadcast %cst_178 : f32 to vector<2x8xf32>
    %350 = arith.mulf %349, %333 : vector<2x8xf32>
    %cst_179 = arith.constant 0.0354008414 : f32
    %351 = vector.broadcast %cst_179 : f32 to vector<2x8xf32>
    %352 = arith.mulf %351, %348 : vector<2x8xf32>
    %353 = arith.subf %350, %352 : vector<2x8xf32>
    %c14_180 = arith.constant 14 : index
    %c0_181 = arith.constant 0 : index
    %c0_182 = arith.constant 0 : index
    %354 = vector.load %arg2[%c14_180, %c0_181, %c0_182] : memref<24x2x8xf32, #tpu.memory_space<vmem>>, vector<1x2x8xf32>
    %355 = vector.shape_cast %354 : vector<1x2x8xf32> to vector<2x8xf32>
    %356 = arith.addf %353, %355 : vector<2x8xf32>
    %c15 = arith.constant 15 : index
    %c0_183 = arith.constant 0 : index
    %357 = vector.load %arg3[%c15, %c0_183] : memref<24x32xf32, #tpu.memory_space<vmem>>, vector<1x32xf32>
    %cst_184 = arith.constant dense<0.000000e+00> : vector<2x32xf32>
    %358 = tpu.matmul %356, %6, %cst_184 {dimension_numbers = #tpu.dot_dimension_numbers<[1], [0], [0], [1], [0, 0, 1, 1], [], []>} : vector<2x8xf32>, vector<8x32xf32>, vector<2x32xf32> -> vector<2x32xf32>
    %359 = vector.broadcast %357 : vector<1x32xf32> to vector<2x32xf32>
    %360 = arith.addf %358, %359 : vector<2x32xf32>
    %361 = arith.addf %360, %5 : vector<2x32xf32>
    %cst_185 = arith.constant 0.000000e+00 : f32
    %362 = vector.broadcast %cst_185 : f32 to vector<2x32xf32>
    %363 = arith.maximumf %361, %362 : vector<2x32xf32>
    %cst_186 = arith.constant dense<0.000000e+00> : vector<2x32xf32>
    %364 = tpu.matmul %363, %7, %cst_186 {dimension_numbers = #tpu.dot_dimension_numbers<[1], [0], [0], [1], [0, 0, 1, 1], [], []>} : vector<2x32xf32>, vector<32x32xf32>, vector<2x32xf32> -> vector<2x32xf32>
    %365 = vector.broadcast %8 : vector<1x32xf32> to vector<2x32xf32>
    %366 = arith.addf %364, %365 : vector<2x32xf32>
    %cst_187 = arith.constant 0.000000e+00 : f32
    %367 = vector.broadcast %cst_187 : f32 to vector<2x32xf32>
    %368 = arith.maximumf %366, %367 : vector<2x32xf32>
    %cst_188 = arith.constant dense<0.000000e+00> : vector<2x8xf32>
    %369 = tpu.matmul %368, %9, %cst_188 {dimension_numbers = #tpu.dot_dimension_numbers<[1], [0], [0], [1], [0, 0, 1, 1], [], []>} : vector<2x32xf32>, vector<32x8xf32>, vector<2x8xf32> -> vector<2x8xf32>
    %370 = vector.broadcast %10 : vector<1x8xf32> to vector<2x8xf32>
    %371 = arith.addf %369, %370 : vector<2x8xf32>
    %cst_189 = arith.constant 1.00005007 : f32
    %372 = vector.broadcast %cst_189 : f32 to vector<2x8xf32>
    %373 = arith.mulf %372, %356 : vector<2x8xf32>
    %cst_190 = arith.constant 0.00707200868 : f32
    %374 = vector.broadcast %cst_190 : f32 to vector<2x8xf32>
    %375 = arith.mulf %374, %371 : vector<2x8xf32>
    %376 = arith.subf %373, %375 : vector<2x8xf32>
    %c15_191 = arith.constant 15 : index
    %c0_192 = arith.constant 0 : index
    %c0_193 = arith.constant 0 : index
    %377 = vector.load %arg2[%c15_191, %c0_192, %c0_193] : memref<24x2x8xf32, #tpu.memory_space<vmem>>, vector<1x2x8xf32>
    %378 = vector.shape_cast %377 : vector<1x2x8xf32> to vector<2x8xf32>
    %379 = arith.addf %376, %378 : vector<2x8xf32>
    %c16 = arith.constant 16 : index
    %c0_194 = arith.constant 0 : index
    %380 = vector.load %arg3[%c16, %c0_194] : memref<24x32xf32, #tpu.memory_space<vmem>>, vector<1x32xf32>
    %cst_195 = arith.constant dense<0.000000e+00> : vector<2x32xf32>
    %381 = tpu.matmul %379, %6, %cst_195 {dimension_numbers = #tpu.dot_dimension_numbers<[1], [0], [0], [1], [0, 0, 1, 1], [], []>} : vector<2x8xf32>, vector<8x32xf32>, vector<2x32xf32> -> vector<2x32xf32>
    %382 = vector.broadcast %380 : vector<1x32xf32> to vector<2x32xf32>
    %383 = arith.addf %381, %382 : vector<2x32xf32>
    %384 = arith.addf %383, %5 : vector<2x32xf32>
    %cst_196 = arith.constant 0.000000e+00 : f32
    %385 = vector.broadcast %cst_196 : f32 to vector<2x32xf32>
    %386 = arith.maximumf %384, %385 : vector<2x32xf32>
    %cst_197 = arith.constant dense<0.000000e+00> : vector<2x32xf32>
    %387 = tpu.matmul %386, %7, %cst_197 {dimension_numbers = #tpu.dot_dimension_numbers<[1], [0], [0], [1], [0, 0, 1, 1], [], []>} : vector<2x32xf32>, vector<32x32xf32>, vector<2x32xf32> -> vector<2x32xf32>
    %388 = vector.broadcast %8 : vector<1x32xf32> to vector<2x32xf32>
    %389 = arith.addf %387, %388 : vector<2x32xf32>
    %cst_198 = arith.constant 0.000000e+00 : f32
    %390 = vector.broadcast %cst_198 : f32 to vector<2x32xf32>
    %391 = arith.maximumf %389, %390 : vector<2x32xf32>
    %cst_199 = arith.constant dense<0.000000e+00> : vector<2x8xf32>
    %392 = tpu.matmul %391, %9, %cst_199 {dimension_numbers = #tpu.dot_dimension_numbers<[1], [0], [0], [1], [0, 0, 1, 1], [], []>} : vector<2x32xf32>, vector<32x8xf32>, vector<2x8xf32> -> vector<2x8xf32>
    %393 = vector.broadcast %10 : vector<1x8xf32> to vector<2x8xf32>
    %394 = arith.addf %392, %393 : vector<2x8xf32>
    %cst_200 = arith.constant 1.00005007 : f32
    %395 = vector.broadcast %cst_200 : f32 to vector<2x8xf32>
    %396 = arith.mulf %395, %379 : vector<2x8xf32>
    %cst_201 = arith.constant 0.00707200868 : f32
    %397 = vector.broadcast %cst_201 : f32 to vector<2x8xf32>
    %398 = arith.mulf %397, %394 : vector<2x8xf32>
    %399 = arith.subf %396, %398 : vector<2x8xf32>
    %c16_202 = arith.constant 16 : index
    %c0_203 = arith.constant 0 : index
    %c0_204 = arith.constant 0 : index
    %400 = vector.load %arg2[%c16_202, %c0_203, %c0_204] : memref<24x2x8xf32, #tpu.memory_space<vmem>>, vector<1x2x8xf32>
    %401 = vector.shape_cast %400 : vector<1x2x8xf32> to vector<2x8xf32>
    %402 = arith.addf %399, %401 : vector<2x8xf32>
    %c17 = arith.constant 17 : index
    %c0_205 = arith.constant 0 : index
    %403 = vector.load %arg3[%c17, %c0_205] : memref<24x32xf32, #tpu.memory_space<vmem>>, vector<1x32xf32>
    %cst_206 = arith.constant dense<0.000000e+00> : vector<2x32xf32>
    %404 = tpu.matmul %402, %6, %cst_206 {dimension_numbers = #tpu.dot_dimension_numbers<[1], [0], [0], [1], [0, 0, 1, 1], [], []>} : vector<2x8xf32>, vector<8x32xf32>, vector<2x32xf32> -> vector<2x32xf32>
    %405 = vector.broadcast %403 : vector<1x32xf32> to vector<2x32xf32>
    %406 = arith.addf %404, %405 : vector<2x32xf32>
    %407 = arith.addf %406, %5 : vector<2x32xf32>
    %cst_207 = arith.constant 0.000000e+00 : f32
    %408 = vector.broadcast %cst_207 : f32 to vector<2x32xf32>
    %409 = arith.maximumf %407, %408 : vector<2x32xf32>
    %cst_208 = arith.constant dense<0.000000e+00> : vector<2x32xf32>
    %410 = tpu.matmul %409, %7, %cst_208 {dimension_numbers = #tpu.dot_dimension_numbers<[1], [0], [0], [1], [0, 0, 1, 1], [], []>} : vector<2x32xf32>, vector<32x32xf32>, vector<2x32xf32> -> vector<2x32xf32>
    %411 = vector.broadcast %8 : vector<1x32xf32> to vector<2x32xf32>
    %412 = arith.addf %410, %411 : vector<2x32xf32>
    %cst_209 = arith.constant 0.000000e+00 : f32
    %413 = vector.broadcast %cst_209 : f32 to vector<2x32xf32>
    %414 = arith.maximumf %412, %413 : vector<2x32xf32>
    %cst_210 = arith.constant dense<0.000000e+00> : vector<2x8xf32>
    %415 = tpu.matmul %414, %9, %cst_210 {dimension_numbers = #tpu.dot_dimension_numbers<[1], [0], [0], [1], [0, 0, 1, 1], [], []>} : vector<2x32xf32>, vector<32x8xf32>, vector<2x8xf32> -> vector<2x8xf32>
    %416 = vector.broadcast %10 : vector<1x8xf32> to vector<2x8xf32>
    %417 = arith.addf %415, %416 : vector<2x8xf32>
    %cst_211 = arith.constant 1.00005007 : f32
    %418 = vector.broadcast %cst_211 : f32 to vector<2x8xf32>
    %419 = arith.mulf %418, %402 : vector<2x8xf32>
    %cst_212 = arith.constant 0.00707200868 : f32
    %420 = vector.broadcast %cst_212 : f32 to vector<2x8xf32>
    %421 = arith.mulf %420, %417 : vector<2x8xf32>
    %422 = arith.subf %419, %421 : vector<2x8xf32>
    %c17_213 = arith.constant 17 : index
    %c0_214 = arith.constant 0 : index
    %c0_215 = arith.constant 0 : index
    %423 = vector.load %arg2[%c17_213, %c0_214, %c0_215] : memref<24x2x8xf32, #tpu.memory_space<vmem>>, vector<1x2x8xf32>
    %424 = vector.shape_cast %423 : vector<1x2x8xf32> to vector<2x8xf32>
    %425 = arith.addf %422, %424 : vector<2x8xf32>
    %c18 = arith.constant 18 : index
    %c0_216 = arith.constant 0 : index
    %426 = vector.load %arg3[%c18, %c0_216] : memref<24x32xf32, #tpu.memory_space<vmem>>, vector<1x32xf32>
    %cst_217 = arith.constant dense<0.000000e+00> : vector<2x32xf32>
    %427 = tpu.matmul %425, %6, %cst_217 {dimension_numbers = #tpu.dot_dimension_numbers<[1], [0], [0], [1], [0, 0, 1, 1], [], []>} : vector<2x8xf32>, vector<8x32xf32>, vector<2x32xf32> -> vector<2x32xf32>
    %428 = vector.broadcast %426 : vector<1x32xf32> to vector<2x32xf32>
    %429 = arith.addf %427, %428 : vector<2x32xf32>
    %430 = arith.addf %429, %5 : vector<2x32xf32>
    %cst_218 = arith.constant 0.000000e+00 : f32
    %431 = vector.broadcast %cst_218 : f32 to vector<2x32xf32>
    %432 = arith.maximumf %430, %431 : vector<2x32xf32>
    %cst_219 = arith.constant dense<0.000000e+00> : vector<2x32xf32>
    %433 = tpu.matmul %432, %7, %cst_219 {dimension_numbers = #tpu.dot_dimension_numbers<[1], [0], [0], [1], [0, 0, 1, 1], [], []>} : vector<2x32xf32>, vector<32x32xf32>, vector<2x32xf32> -> vector<2x32xf32>
    %434 = vector.broadcast %8 : vector<1x32xf32> to vector<2x32xf32>
    %435 = arith.addf %433, %434 : vector<2x32xf32>
    %cst_220 = arith.constant 0.000000e+00 : f32
    %436 = vector.broadcast %cst_220 : f32 to vector<2x32xf32>
    %437 = arith.maximumf %435, %436 : vector<2x32xf32>
    %cst_221 = arith.constant dense<0.000000e+00> : vector<2x8xf32>
    %438 = tpu.matmul %437, %9, %cst_221 {dimension_numbers = #tpu.dot_dimension_numbers<[1], [0], [0], [1], [0, 0, 1, 1], [], []>} : vector<2x32xf32>, vector<32x8xf32>, vector<2x8xf32> -> vector<2x8xf32>
    %439 = vector.broadcast %10 : vector<1x8xf32> to vector<2x8xf32>
    %440 = arith.addf %438, %439 : vector<2x8xf32>
    %cst_222 = arith.constant 1.00005007 : f32
    %441 = vector.broadcast %cst_222 : f32 to vector<2x8xf32>
    %442 = arith.mulf %441, %425 : vector<2x8xf32>
    %cst_223 = arith.constant 0.00707200868 : f32
    %443 = vector.broadcast %cst_223 : f32 to vector<2x8xf32>
    %444 = arith.mulf %443, %440 : vector<2x8xf32>
    %445 = arith.subf %442, %444 : vector<2x8xf32>
    %c18_224 = arith.constant 18 : index
    %c0_225 = arith.constant 0 : index
    %c0_226 = arith.constant 0 : index
    %446 = vector.load %arg2[%c18_224, %c0_225, %c0_226] : memref<24x2x8xf32, #tpu.memory_space<vmem>>, vector<1x2x8xf32>
    %447 = vector.shape_cast %446 : vector<1x2x8xf32> to vector<2x8xf32>
    %448 = arith.addf %445, %447 : vector<2x8xf32>
    %c19 = arith.constant 19 : index
    %c0_227 = arith.constant 0 : index
    %449 = vector.load %arg3[%c19, %c0_227] : memref<24x32xf32, #tpu.memory_space<vmem>>, vector<1x32xf32>
    %cst_228 = arith.constant dense<0.000000e+00> : vector<2x32xf32>
    %450 = tpu.matmul %448, %6, %cst_228 {dimension_numbers = #tpu.dot_dimension_numbers<[1], [0], [0], [1], [0, 0, 1, 1], [], []>} : vector<2x8xf32>, vector<8x32xf32>, vector<2x32xf32> -> vector<2x32xf32>
    %451 = vector.broadcast %449 : vector<1x32xf32> to vector<2x32xf32>
    %452 = arith.addf %450, %451 : vector<2x32xf32>
    %453 = arith.addf %452, %5 : vector<2x32xf32>
    %cst_229 = arith.constant 0.000000e+00 : f32
    %454 = vector.broadcast %cst_229 : f32 to vector<2x32xf32>
    %455 = arith.maximumf %453, %454 : vector<2x32xf32>
    %cst_230 = arith.constant dense<0.000000e+00> : vector<2x32xf32>
    %456 = tpu.matmul %455, %7, %cst_230 {dimension_numbers = #tpu.dot_dimension_numbers<[1], [0], [0], [1], [0, 0, 1, 1], [], []>} : vector<2x32xf32>, vector<32x32xf32>, vector<2x32xf32> -> vector<2x32xf32>
    %457 = vector.broadcast %8 : vector<1x32xf32> to vector<2x32xf32>
    %458 = arith.addf %456, %457 : vector<2x32xf32>
    %cst_231 = arith.constant 0.000000e+00 : f32
    %459 = vector.broadcast %cst_231 : f32 to vector<2x32xf32>
    %460 = arith.maximumf %458, %459 : vector<2x32xf32>
    %cst_232 = arith.constant dense<0.000000e+00> : vector<2x8xf32>
    %461 = tpu.matmul %460, %9, %cst_232 {dimension_numbers = #tpu.dot_dimension_numbers<[1], [0], [0], [1], [0, 0, 1, 1], [], []>} : vector<2x32xf32>, vector<32x8xf32>, vector<2x8xf32> -> vector<2x8xf32>
    %462 = vector.broadcast %10 : vector<1x8xf32> to vector<2x8xf32>
    %463 = arith.addf %461, %462 : vector<2x8xf32>
    %cst_233 = arith.constant 1.00005007 : f32
    %464 = vector.broadcast %cst_233 : f32 to vector<2x8xf32>
    %465 = arith.mulf %464, %448 : vector<2x8xf32>
    %cst_234 = arith.constant 0.00707200868 : f32
    %466 = vector.broadcast %cst_234 : f32 to vector<2x8xf32>
    %467 = arith.mulf %466, %463 : vector<2x8xf32>
    %468 = arith.subf %465, %467 : vector<2x8xf32>
    %c19_235 = arith.constant 19 : index
    %c0_236 = arith.constant 0 : index
    %c0_237 = arith.constant 0 : index
    %469 = vector.load %arg2[%c19_235, %c0_236, %c0_237] : memref<24x2x8xf32, #tpu.memory_space<vmem>>, vector<1x2x8xf32>
    %470 = vector.shape_cast %469 : vector<1x2x8xf32> to vector<2x8xf32>
    %471 = arith.addf %468, %470 : vector<2x8xf32>
    %c20 = arith.constant 20 : index
    %c0_238 = arith.constant 0 : index
    %472 = vector.load %arg3[%c20, %c0_238] : memref<24x32xf32, #tpu.memory_space<vmem>>, vector<1x32xf32>
    %cst_239 = arith.constant dense<0.000000e+00> : vector<2x32xf32>
    %473 = tpu.matmul %471, %6, %cst_239 {dimension_numbers = #tpu.dot_dimension_numbers<[1], [0], [0], [1], [0, 0, 1, 1], [], []>} : vector<2x8xf32>, vector<8x32xf32>, vector<2x32xf32> -> vector<2x32xf32>
    %474 = vector.broadcast %472 : vector<1x32xf32> to vector<2x32xf32>
    %475 = arith.addf %473, %474 : vector<2x32xf32>
    %476 = arith.addf %475, %5 : vector<2x32xf32>
    %cst_240 = arith.constant 0.000000e+00 : f32
    %477 = vector.broadcast %cst_240 : f32 to vector<2x32xf32>
    %478 = arith.maximumf %476, %477 : vector<2x32xf32>
    %cst_241 = arith.constant dense<0.000000e+00> : vector<2x32xf32>
    %479 = tpu.matmul %478, %7, %cst_241 {dimension_numbers = #tpu.dot_dimension_numbers<[1], [0], [0], [1], [0, 0, 1, 1], [], []>} : vector<2x32xf32>, vector<32x32xf32>, vector<2x32xf32> -> vector<2x32xf32>
    %480 = vector.broadcast %8 : vector<1x32xf32> to vector<2x32xf32>
    %481 = arith.addf %479, %480 : vector<2x32xf32>
    %cst_242 = arith.constant 0.000000e+00 : f32
    %482 = vector.broadcast %cst_242 : f32 to vector<2x32xf32>
    %483 = arith.maximumf %481, %482 : vector<2x32xf32>
    %cst_243 = arith.constant dense<0.000000e+00> : vector<2x8xf32>
    %484 = tpu.matmul %483, %9, %cst_243 {dimension_numbers = #tpu.dot_dimension_numbers<[1], [0], [0], [1], [0, 0, 1, 1], [], []>} : vector<2x32xf32>, vector<32x8xf32>, vector<2x8xf32> -> vector<2x8xf32>
    %485 = vector.broadcast %10 : vector<1x8xf32> to vector<2x8xf32>
    %486 = arith.addf %484, %485 : vector<2x8xf32>
    %cst_244 = arith.constant 1.00005007 : f32
    %487 = vector.broadcast %cst_244 : f32 to vector<2x8xf32>
    %488 = arith.mulf %487, %471 : vector<2x8xf32>
    %cst_245 = arith.constant 0.00707200868 : f32
    %489 = vector.broadcast %cst_245 : f32 to vector<2x8xf32>
    %490 = arith.mulf %489, %486 : vector<2x8xf32>
    %491 = arith.subf %488, %490 : vector<2x8xf32>
    %c20_246 = arith.constant 20 : index
    %c0_247 = arith.constant 0 : index
    %c0_248 = arith.constant 0 : index
    %492 = vector.load %arg2[%c20_246, %c0_247, %c0_248] : memref<24x2x8xf32, #tpu.memory_space<vmem>>, vector<1x2x8xf32>
    %493 = vector.shape_cast %492 : vector<1x2x8xf32> to vector<2x8xf32>
    %494 = arith.addf %491, %493 : vector<2x8xf32>
    %c21 = arith.constant 21 : index
    %c0_249 = arith.constant 0 : index
    %495 = vector.load %arg3[%c21, %c0_249] : memref<24x32xf32, #tpu.memory_space<vmem>>, vector<1x32xf32>
    %cst_250 = arith.constant dense<0.000000e+00> : vector<2x32xf32>
    %496 = tpu.matmul %494, %6, %cst_250 {dimension_numbers = #tpu.dot_dimension_numbers<[1], [0], [0], [1], [0, 0, 1, 1], [], []>} : vector<2x8xf32>, vector<8x32xf32>, vector<2x32xf32> -> vector<2x32xf32>
    %497 = vector.broadcast %495 : vector<1x32xf32> to vector<2x32xf32>
    %498 = arith.addf %496, %497 : vector<2x32xf32>
    %499 = arith.addf %498, %5 : vector<2x32xf32>
    %cst_251 = arith.constant 0.000000e+00 : f32
    %500 = vector.broadcast %cst_251 : f32 to vector<2x32xf32>
    %501 = arith.maximumf %499, %500 : vector<2x32xf32>
    %cst_252 = arith.constant dense<0.000000e+00> : vector<2x32xf32>
    %502 = tpu.matmul %501, %7, %cst_252 {dimension_numbers = #tpu.dot_dimension_numbers<[1], [0], [0], [1], [0, 0, 1, 1], [], []>} : vector<2x32xf32>, vector<32x32xf32>, vector<2x32xf32> -> vector<2x32xf32>
    %503 = vector.broadcast %8 : vector<1x32xf32> to vector<2x32xf32>
    %504 = arith.addf %502, %503 : vector<2x32xf32>
    %cst_253 = arith.constant 0.000000e+00 : f32
    %505 = vector.broadcast %cst_253 : f32 to vector<2x32xf32>
    %506 = arith.maximumf %504, %505 : vector<2x32xf32>
    %cst_254 = arith.constant dense<0.000000e+00> : vector<2x8xf32>
    %507 = tpu.matmul %506, %9, %cst_254 {dimension_numbers = #tpu.dot_dimension_numbers<[1], [0], [0], [1], [0, 0, 1, 1], [], []>} : vector<2x32xf32>, vector<32x8xf32>, vector<2x8xf32> -> vector<2x8xf32>
    %508 = vector.broadcast %10 : vector<1x8xf32> to vector<2x8xf32>
    %509 = arith.addf %507, %508 : vector<2x8xf32>
    %cst_255 = arith.constant 1.00005007 : f32
    %510 = vector.broadcast %cst_255 : f32 to vector<2x8xf32>
    %511 = arith.mulf %510, %494 : vector<2x8xf32>
    %cst_256 = arith.constant 0.00707200868 : f32
    %512 = vector.broadcast %cst_256 : f32 to vector<2x8xf32>
    %513 = arith.mulf %512, %509 : vector<2x8xf32>
    %514 = arith.subf %511, %513 : vector<2x8xf32>
    %c21_257 = arith.constant 21 : index
    %c0_258 = arith.constant 0 : index
    %c0_259 = arith.constant 0 : index
    %515 = vector.load %arg2[%c21_257, %c0_258, %c0_259] : memref<24x2x8xf32, #tpu.memory_space<vmem>>, vector<1x2x8xf32>
    %516 = vector.shape_cast %515 : vector<1x2x8xf32> to vector<2x8xf32>
    %517 = arith.addf %514, %516 : vector<2x8xf32>
    %c22 = arith.constant 22 : index
    %c0_260 = arith.constant 0 : index
    %518 = vector.load %arg3[%c22, %c0_260] : memref<24x32xf32, #tpu.memory_space<vmem>>, vector<1x32xf32>
    %cst_261 = arith.constant dense<0.000000e+00> : vector<2x32xf32>
    %519 = tpu.matmul %517, %6, %cst_261 {dimension_numbers = #tpu.dot_dimension_numbers<[1], [0], [0], [1], [0, 0, 1, 1], [], []>} : vector<2x8xf32>, vector<8x32xf32>, vector<2x32xf32> -> vector<2x32xf32>
    %520 = vector.broadcast %518 : vector<1x32xf32> to vector<2x32xf32>
    %521 = arith.addf %519, %520 : vector<2x32xf32>
    %522 = arith.addf %521, %5 : vector<2x32xf32>
    %cst_262 = arith.constant 0.000000e+00 : f32
    %523 = vector.broadcast %cst_262 : f32 to vector<2x32xf32>
    %524 = arith.maximumf %522, %523 : vector<2x32xf32>
    %cst_263 = arith.constant dense<0.000000e+00> : vector<2x32xf32>
    %525 = tpu.matmul %524, %7, %cst_263 {dimension_numbers = #tpu.dot_dimension_numbers<[1], [0], [0], [1], [0, 0, 1, 1], [], []>} : vector<2x32xf32>, vector<32x32xf32>, vector<2x32xf32> -> vector<2x32xf32>
    %526 = vector.broadcast %8 : vector<1x32xf32> to vector<2x32xf32>
    %527 = arith.addf %525, %526 : vector<2x32xf32>
    %cst_264 = arith.constant 0.000000e+00 : f32
    %528 = vector.broadcast %cst_264 : f32 to vector<2x32xf32>
    %529 = arith.maximumf %527, %528 : vector<2x32xf32>
    %cst_265 = arith.constant dense<0.000000e+00> : vector<2x8xf32>
    %530 = tpu.matmul %529, %9, %cst_265 {dimension_numbers = #tpu.dot_dimension_numbers<[1], [0], [0], [1], [0, 0, 1, 1], [], []>} : vector<2x32xf32>, vector<32x8xf32>, vector<2x8xf32> -> vector<2x8xf32>
    %531 = vector.broadcast %10 : vector<1x8xf32> to vector<2x8xf32>
    %532 = arith.addf %530, %531 : vector<2x8xf32>
    %cst_266 = arith.constant 1.00005007 : f32
    %533 = vector.broadcast %cst_266 : f32 to vector<2x8xf32>
    %534 = arith.mulf %533, %517 : vector<2x8xf32>
    %cst_267 = arith.constant 0.00707200868 : f32
    %535 = vector.broadcast %cst_267 : f32 to vector<2x8xf32>
    %536 = arith.mulf %535, %532 : vector<2x8xf32>
    %537 = arith.subf %534, %536 : vector<2x8xf32>
    %c22_268 = arith.constant 22 : index
    %c0_269 = arith.constant 0 : index
    %c0_270 = arith.constant 0 : index
    %538 = vector.load %arg2[%c22_268, %c0_269, %c0_270] : memref<24x2x8xf32, #tpu.memory_space<vmem>>, vector<1x2x8xf32>
    %539 = vector.shape_cast %538 : vector<1x2x8xf32> to vector<2x8xf32>
    %540 = arith.addf %537, %539 : vector<2x8xf32>
    %c23 = arith.constant 23 : index
    %c0_271 = arith.constant 0 : index
    %541 = vector.load %arg3[%c23, %c0_271] : memref<24x32xf32, #tpu.memory_space<vmem>>, vector<1x32xf32>
    %cst_272 = arith.constant dense<0.000000e+00> : vector<2x32xf32>
    %542 = tpu.matmul %540, %6, %cst_272 {dimension_numbers = #tpu.dot_dimension_numbers<[1], [0], [0], [1], [0, 0, 1, 1], [], []>} : vector<2x8xf32>, vector<8x32xf32>, vector<2x32xf32> -> vector<2x32xf32>
    %543 = vector.broadcast %541 : vector<1x32xf32> to vector<2x32xf32>
    %544 = arith.addf %542, %543 : vector<2x32xf32>
    %545 = arith.addf %544, %5 : vector<2x32xf32>
    %cst_273 = arith.constant 0.000000e+00 : f32
    %546 = vector.broadcast %cst_273 : f32 to vector<2x32xf32>
    %547 = arith.maximumf %545, %546 : vector<2x32xf32>
    %cst_274 = arith.constant dense<0.000000e+00> : vector<2x32xf32>
    %548 = tpu.matmul %547, %7, %cst_274 {dimension_numbers = #tpu.dot_dimension_numbers<[1], [0], [0], [1], [0, 0, 1, 1], [], []>} : vector<2x32xf32>, vector<32x32xf32>, vector<2x32xf32> -> vector<2x32xf32>
    %549 = vector.broadcast %8 : vector<1x32xf32> to vector<2x32xf32>
    %550 = arith.addf %548, %549 : vector<2x32xf32>
    %cst_275 = arith.constant 0.000000e+00 : f32
    %551 = vector.broadcast %cst_275 : f32 to vector<2x32xf32>
    %552 = arith.maximumf %550, %551 : vector<2x32xf32>
    %cst_276 = arith.constant dense<0.000000e+00> : vector<2x8xf32>
    %553 = tpu.matmul %552, %9, %cst_276 {dimension_numbers = #tpu.dot_dimension_numbers<[1], [0], [0], [1], [0, 0, 1, 1], [], []>} : vector<2x32xf32>, vector<32x8xf32>, vector<2x8xf32> -> vector<2x8xf32>
    %554 = vector.broadcast %10 : vector<1x8xf32> to vector<2x8xf32>
    %555 = arith.addf %553, %554 : vector<2x8xf32>
    %cst_277 = arith.constant 1.00005007 : f32
    %556 = vector.broadcast %cst_277 : f32 to vector<2x8xf32>
    %557 = arith.mulf %556, %540 : vector<2x8xf32>
    %cst_278 = arith.constant 0.00707200868 : f32
    %558 = vector.broadcast %cst_278 : f32 to vector<2x8xf32>
    %559 = arith.mulf %558, %555 : vector<2x8xf32>
    %560 = arith.subf %557, %559 : vector<2x8xf32>
    %c23_279 = arith.constant 23 : index
    %c0_280 = arith.constant 0 : index
    %c0_281 = arith.constant 0 : index
    %561 = vector.load %arg2[%c23_279, %c0_280, %c0_281] : memref<24x2x8xf32, #tpu.memory_space<vmem>>, vector<1x2x8xf32>
    %562 = vector.shape_cast %561 : vector<1x2x8xf32> to vector<2x8xf32>
    %563 = arith.addf %560, %562 : vector<2x8xf32>
    %c0_282 = arith.constant 0 : index
    %c0_283 = arith.constant 0 : index
    %564 = vector.load %arg11[%c0_282, %c0_283] : memref<2x8xf32, #tpu.memory_space<vmem>>, vector<2x8xf32>
    tpu.vector_store %arg11[%c0_282, %c0_283], %563 {strides = array<i32>} : memref<2x8xf32, #tpu.memory_space<vmem>>, vector<2x8xf32>,
    return
  }
}

</mosaic_0001>

<bundles_post_ra>
// kernel: tpu_custom_call.1
= control target key start
LH: loop header
LB: loop body
LE: loop exit
PB: predicated region body
PF: predicated region fallthrough
CT: control target
= control target key end

     0   :  { %vm46_vm0 = vcmask 130048   ;;  %vm84_vm1 = vcmask 64512   ;;  %s2848_s0 = inlined_call_operand.vmem [shape: f32[2,8], index: 0, kind: input, shape index: {}]   ;;  %s2849_s1 = inlined_call_operand.vmem [shape: f32[2,16], index: 1, kind: input, shape index: {}]   ;;  %s2850_s2 = inlined_call_operand.vmem [shape: f32[24,2,8], index: 2, kind: input, shape index: {}]   ;;  %s2851_s3 = inlined_call_operand.vmem [shape: f32[24,32], index: 3, kind: input, shape index: {}]   ;;  %s2852_s4 = inlined_call_operand.vmem [shape: f32[8,32], index: 4, kind: input, shape index: {}]   ;;  %s2853_s5 = inlined_call_operand.vmem [shape: f32[16,32], index: 5, kind: input, shape index: {}]   ;;  %s2854_s6 = inlined_call_operand.vmem [shape: f32[1,32], index: 6, kind: input, shape index: {}]   ;;  %s2855_s7 = inlined_call_operand.vmem [shape: f32[32,32], index: 7, kind: input, shape index: {}]   ;;  %s2856_s8 = inlined_call_operand.vmem [shape: f32[1,32], index: 8, kind: input, shape index: {}]   ;;  %s2857_s9 = inlined_call_operand.vmem [shape: f32[32,8], index: 9, kind: input, shape index: {}]   ;;  %s2858_s10 = inlined_call_operand.vmem [shape: f32[1,8], index: 10, kind: input, shape index: {}]   ;;  %s2859_s11 = inlined_call_operand.hbm [shape: f32[2,8], index: 11, kind: output, shape index: {}]  }
   0x1   :  { %v41_v0 = vld [vmem:[%s2853_s5 + $0x8] sm:$0xff]  ;;  %v40_v1 = vld [vmem:[%s2853_s5] sm:$0xff] }
   0x2   :  { %v2258_v2 = vld [vmem:[%s2852_s4] sm:$0xff]  ;;  %64 = vmatpush.msra.mxu0 %v41_v0 }
   0x3   :  { %103 = vmatpush.msra.mxu1 %v2258_v2  ;;  %v39_v3 = vld [vmem:[%s2849_s1] sm:$0x3] }
   0x4   :  { %v81_v4 = vld [vmem:[%s2848_s0] sm:$0x3]  ;;  %65 = vmatpush.msra.mxu0 %v40_v1 }
   0x5   :  { %2028 = vmatmul.msk.f32.vlgmr.msra.gmra.mxu1 %vm84_vm1, %v81_v4  ;;  %2027 = vmatmul.msk.f32.vlgmr.msra.gmra.mxu0 %vm46_vm0, %v39_v3 }
   0x6   :  { %189 = vmatpush.msrb.mxu1 %v2258_v2 }
   0x7   :  { %16 = vsyncpa [#allocation3], 0  ;;  %v2272_v5 = vld [vmem:[%s2855_s7 + $0x18] sm:$0xff]  ;;  %v2279_v6 = vld [vmem:[%s2855_s7 + $0x10] sm:$0xff]  ;;  %vm113_vm2 = vcmask 261120   ;;  %s2188_s21 = smov [#allocation2]  }
   0x8   :  { %129 = vmatpush.msra.mxu2 %v2272_v5  ;;  %211 = vmatpush.msrb.mxu0 %v2272_v5  ;;  %v2287_v7 = vld [vmem:[%s2855_s7 + $0x8] sm:$0xff]  ;;  %v2295_v8 = vld [vmem:[%s2855_s7] sm:$0xff]  ;;  %v2303_v9 = vld [vmem:[%s2857_s9 + $0x18] sm:$0xff]  ;;  %v164_v27 = vmul.f32 1.0101525, %v81_v4  ;;  %s2016_s22 = sshll.u32 %s2188_s21, 4  ;;  %s2017_s22 = int_to_ptr.vmem [resolvable:$true] %s2016_s22 }
   0x9   :  { %291 = vmatpush.msra.mxu1 %v2272_v5  ;;  %156 = vmatpush.msra.mxu3 %v2303_v9  ;;  %v2125_v10 = vld [vmem:[%s2851_s3] ss:$0 sm:$0xff]  ;;  %v2322_v18 = vld [vmem:[%s2857_s9 + $0x10] sm:$0xff]  ;;  %v2329_v19 = vld [vmem:[%s2857_s9 + $0x8] sm:$0xff]  ;;  %vm2009_vm3 = vcmask 58368  }
   0xa   :  { %130 = vmatpush.msra.mxu2 %v2279_v6  ;;  %212 = vmatpush.msrb.mxu0 %v2279_v6  ;;  %v2124_v11 = vld [vmem:[%s2854_s6] ss:$0 sm:$0xff]  ;;  %v2128_v33 = vld [vmem:[%s2851_s3 + $0x1] ss:$0 sm:$0xff]  ;;  %v2034_v45 = vld [vmem:[%s2850_s2 + $0x2] sm:$0x3] }
   0xb   :  { %292 = vmatpush.msra.mxu1 %v2279_v6  ;;  %157 = vmatpush.msra.mxu3 %v2322_v18  ;;  %v2337_v20 = vld [vmem:[%s2857_s9] sm:$0xff] }
   0xc   :  { %131 = vmatpush.msra.mxu2 %v2287_v7  ;;  %213 = vmatpush.msrb.mxu0 %v2287_v7  ;;  %v2348_v21 = vld [vmem:[%s2856_s8] ss:$0 sm:$0xff]  ;;  %v2129_v48 = vld [vmem:[%s2851_s3 + $0x2] ss:$0 sm:$0xff]  ;;  %v2038_v60 = vld [vmem:[%s2850_s2 + $0x4] sm:$0x3] }
   0xd   :  { %293 = vmatpush.msra.mxu1 %v2287_v7  ;;  %158 = vmatpush.msra.mxu3 %v2329_v19  ;;  %v2359_v25 = vld [vmem:[%s2858_s10] ss:$0 sm:$0xff]  ;;  %v2130_v63 = vld [vmem:[%s2851_s3 + $0x3] ss:$0 sm:$0xff] }
   0xe   :  { %132 = vmatpush.msra.mxu2 %v2295_v8  ;;  %214 = vmatpush.msrb.mxu0 %v2295_v8  ;;  %v167_v30 = vld [vmem:[%s2850_s2] sm:$0x3] }
   0xf   :  { %294 = vmatpush.msra.mxu1 %v2295_v8  ;;  %159 = vmatpush.msra.mxu3 %v2337_v20 }
  0x10   :  { %235 = vmatpush.msrb.mxu2 %v2303_v9  ;;  %315 = vmatpush.msra.mxu0 %v2303_v9 }
  0x11   :  { %269 = vmatpush.msrb.mxu3 %v2258_v2 }
  0x12   :  { %236 = vmatpush.msrb.mxu2 %v2322_v18  ;;  %316 = vmatpush.msra.mxu0 %v2322_v18 }
  0x14   :  { %237 = vmatpush.msrb.mxu2 %v2329_v19  ;;  %317 = vmatpush.msra.mxu0 %v2329_v19 }
  0x16   :  { %238 = vmatpush.msrb.mxu2 %v2337_v20  ;;  %318 = vmatpush.msra.mxu0 %v2337_v20 }
  0x82   :  { %v105_v12 = vpop.f32.mrf.mxu1  ;;  %v67_v14 = vpop.f32.mrf.mxu0 }
  0x83   :  { %v106_v13 = vadd.f32 %v2125_v10, %v105_v12  ;;  %v2315_v15 = vadd.f32 %v2124_v11, %v67_v14 }
  0x85   :  { %v108_v16 = vadd.f32 %v106_v13, %v2315_v15 }
  0x87   :  { %v109_v17 = vmax.f32 %v108_v16, 0.0 }
  0x89   :  { %2029 = vmatmul.msk.f32.vlgmr.msra.gmra.mxu2 %vm113_vm2, %v109_v17 }
  0x8a   :  { %349 = vmatpush.msra.mxu2 %v2258_v2 }
 0x10c   :  { %v134_v22 = vpop.f32.mrf.mxu2 }
 0x10d   :  { %v135_v23 = vadd.f32 %v2348_v21, %v134_v22  ;;  %v2042_v22 = vld [vmem:[%s2850_s2 + $0x6] sm:$0x3] }
 0x10f   :  { %v137_v24 = vmax.f32 %v135_v23, 0.0 }
 0x111   :  { %2030 = vmatmul.msk.f32.vlgmr.msra.gmra.mxu3 %vm113_vm2, %v137_v24 }
 0x112   :  { %371 = vmatpush.msra.mxu3 %v2272_v5 }
 0x114   :  { %372 = vmatpush.msra.mxu3 %v2279_v6 }
 0x116   :  { %373 = vmatpush.msra.mxu3 %v2287_v7 }
 0x118   :  { %374 = vmatpush.msra.mxu3 %v2295_v8 }
 0x194   :  { %v161_v26 = vpop.f32.mrf.mxu3 }
 0x195   :  { %v162_v28 = vadd.f32 %v2359_v25, %v161_v26  ;;  %v2131_v26 = vld [vmem:[%s2851_s3 + $0x4] ss:$0 sm:$0xff] }
 0x197   :  { %v165_v29 = vmul.f32 0.05223811, %v162_v28 }
 0x199   :  { %v166_v31 = vsub.f32 %v164_v27, %v165_v29 }
 0x19b   :  { %v168_v32 = vadd.f32 %v167_v30, %v166_v31 }
 0x19d   :  { %2031 = vmatmul.msk.f32.vlgmr.msrb.gmra.mxu1 %vm84_vm1, %v168_v32  ;;  %v243_v43 = vmul.f32 1.0094695, %v168_v32 }
 0x19e   :  { %395 = vmatpush.msrb.mxu1 %v2303_v9 }
 0x1a0   :  { %396 = vmatpush.msrb.mxu1 %v2322_v18 }
 0x1a2   :  { %397 = vmatpush.msrb.mxu1 %v2329_v19 }
 0x1a4   :  { %398 = vmatpush.msrb.mxu1 %v2337_v20 }
 0x21a   :  { %v191_v34 = vpop.f32.mrf.mxu1 }
 0x21b   :  { %v192_v35 = vadd.f32 %v2128_v33, %v191_v34 }
 0x21d   :  { %v194_v36 = vadd.f32 %v192_v35, %v2315_v15 }
 0x21f   :  { %v195_v37 = vmax.f32 %v194_v36, 0.0 }
 0x221   :  { %2032 = vmatmul.msk.f32.vlgmr.msrb.gmra.mxu0 %vm113_vm2, %v195_v37 }
 0x222   :  { %429 = vmatpush.msrb.mxu0 %v2258_v2 }
 0x29e   :  { %v216_v38 = vpop.f32.mrf.mxu0 }
 0x29f   :  { %v217_v39 = vadd.f32 %v2348_v21, %v216_v38  ;;  %v2046_v38 = vld [vmem:[%s2850_s2 + $0x8] sm:$0x3] }
 0x2a1   :  { %v219_v40 = vmax.f32 %v217_v39, 0.0 }
 0x2a3   :  { %2033 = vmatmul.msk.f32.vlgmr.msrb.gmra.mxu2 %vm113_vm2, %v219_v40 }
 0x2a4   :  { %451 = vmatpush.msrb.mxu2 %v2272_v5 }
 0x2a6   :  { %452 = vmatpush.msrb.mxu2 %v2279_v6 }
 0x2a8   :  { %453 = vmatpush.msrb.mxu2 %v2287_v7 }
 0x2aa   :  { %454 = vmatpush.msrb.mxu2 %v2295_v8 }
 0x326   :  { %v240_v41 = vpop.f32.mrf.mxu2 }
 0x327   :  { %v241_v42 = vadd.f32 %v2359_v25, %v240_v41  ;;  %v2132_v41 = vld [vmem:[%s2851_s3 + $0x5] ss:$0 sm:$0xff] }
 0x329   :  { %v244_v44 = vmul.f32 0.051840413, %v241_v42 }
 0x32b   :  { %v245_v46 = vsub.f32 %v243_v43, %v244_v44 }
 0x32d   :  { %v248_v47 = vadd.f32 %v2034_v45, %v245_v46 }
 0x32f   :  { %2035 = vmatmul.msk.f32.vlgmr.msrb.gmra.mxu3 %vm84_vm1, %v248_v47  ;;  %v323_v58 = vmul.f32 1.0087879, %v248_v47 }
 0x330   :  { %475 = vmatpush.msrb.mxu3 %v2303_v9 }
 0x332   :  { %476 = vmatpush.msrb.mxu3 %v2322_v18 }
 0x334   :  { %477 = vmatpush.msrb.mxu3 %v2329_v19 }
 0x336   :  { %478 = vmatpush.msrb.mxu3 %v2337_v20 }
 0x3b2   :  { %v271_v49 = vpop.f32.mrf.mxu3 }
 0x3b3   :  { %v272_v50 = vadd.f32 %v2129_v48, %v271_v49 }
 0x3b5   :  { %v274_v51 = vadd.f32 %v272_v50, %v2315_v15 }
 0x3b7   :  { %v275_v52 = vmax.f32 %v274_v51, 0.0 }
 0x3b9   :  { %2036 = vmatmul.msk.f32.vlgmr.msra.gmra.mxu1 %vm113_vm2, %v275_v52 }
 0x3ba   :  { %509 = vmatpush.msra.mxu1 %v2258_v2 }
 0x436   :  { %v296_v53 = vpop.f32.mrf.mxu1 }
 0x437   :  { %v297_v54 = vadd.f32 %v2348_v21, %v296_v53  ;;  %v2050_v53 = vld [vmem:[%s2850_s2 + $0xa] sm:$0x3] }
 0x439   :  { %v299_v55 = vmax.f32 %v297_v54, 0.0 }
 0x43b   :  { %2037 = vmatmul.msk.f32.vlgmr.msra.gmra.mxu0 %vm113_vm2, %v299_v55 }
 0x43c   :  { %531 = vmatpush.msra.mxu0 %v2272_v5 }
 0x43e   :  { %532 = vmatpush.msra.mxu0 %v2279_v6 }
 0x440   :  { %533 = vmatpush.msra.mxu0 %v2287_v7 }
 0x442   :  { %534 = vmatpush.msra.mxu0 %v2295_v8 }
 0x4b8   :  { %v320_v56 = vpop.f32.mrf.mxu0 }
 0x4b9   :  { %v321_v57 = vadd.f32 %v2359_v25, %v320_v56  ;;  %v2133_v56 = vld [vmem:[%s2851_s3 + $0x6] ss:$0 sm:$0xff] }
 0x4bb   :  { %v324_v59 = vmul.f32 0.051444322, %v321_v57 }
 0x4bd   :  { %v325_v61 = vsub.f32 %v323_v58, %v324_v59 }
 0x4bf   :  { %v328_v62 = vadd.f32 %v2038_v60, %v325_v61 }
 0x4c1   :  { %2039 = vmatmul.msk.f32.vlgmr.msra.gmra.mxu2 %vm84_vm1, %v328_v62  ;;  %v403_v16 = vmul.f32 1.0081075, %v328_v62 }
 0x4c2   :  { %555 = vmatpush.msra.mxu2 %v2303_v9 }
 0x4c4   :  { %556 = vmatpush.msra.mxu2 %v2322_v18 }
 0x4c6   :  { %557 = vmatpush.msra.mxu2 %v2329_v19 }
 0x4c8   :  { %558 = vmatpush.msra.mxu2 %v2337_v20 }
 0x544   :  { %v351_v0 = vpop.f32.mrf.mxu2 }
 0x545   :  { %v352_v1 = vadd.f32 %v2130_v63, %v351_v0 }
 0x547   :  { %v354_v3 = vadd.f32 %v352_v1, %v2315_v15 }
 0x549   :  { %v355_v4 = vmax.f32 %v354_v3, 0.0 }
 0x54b   :  { %2040 = vmatmul.msk.f32.vlgmr.msra.gmra.mxu3 %vm113_vm2, %v355_v4 }
 0x54c   :  { %589 = vmatpush.msra.mxu3 %v2258_v2 }
 0x5ce   :  { %v376_v10 = vpop.f32.mrf.mxu3 }
 0x5cf   :  { %v377_v11 = vadd.f32 %v2348_v21, %v376_v10  ;;  %v2054_v10 = vld [vmem:[%s2850_s2 + $0xc] sm:$0x3] }
 0x5d1   :  { %v379_v12 = vmax.f32 %v377_v11, 0.0 }
 0x5d3   :  { %2041 = vmatmul.msk.f32.vlgmr.msrb.gmra.mxu1 %vm113_vm2, %v379_v12 }
 0x5d4   :  { %611 = vmatpush.msrb.mxu1 %v2272_v5 }
 0x5d6   :  { %612 = vmatpush.msrb.mxu1 %v2279_v6 }
 0x5d8   :  { %613 = vmatpush.msrb.mxu1 %v2287_v7 }
 0x5da   :  { %614 = vmatpush.msrb.mxu1 %v2295_v8 }
 0x650   :  { %v400_v13 = vpop.f32.mrf.mxu1 }
 0x651   :  { %v401_v14 = vadd.f32 %v2359_v25, %v400_v13  ;;  %v2134_v13 = vld [vmem:[%s2851_s3 + $0x7] ss:$0 sm:$0xff] }
 0x653   :  { %v404_v17 = vmul.f32 0.051045887, %v401_v14 }
 0x655   :  { %v405_v23 = vsub.f32 %v403_v16, %v404_v17 }
 0x657   :  { %v408_v24 = vadd.f32 %v2042_v22, %v405_v23 }
 0x659   :  { %2043 = vmatmul.msk.f32.vlgmr.msrb.gmra.mxu0 %vm84_vm1, %v408_v24  ;;  %v483_v36 = vmul.f32 1.0074286, %v408_v24 }
 0x65a   :  { %635 = vmatpush.msrb.mxu0 %v2303_v9 }
 0x65c   :  { %636 = vmatpush.msrb.mxu0 %v2322_v18 }
 0x65e   :  { %637 = vmatpush.msrb.mxu0 %v2329_v19 }
 0x660   :  { %638 = vmatpush.msrb.mxu0 %v2337_v20 }
 0x6d6   :  { %v431_v27 = vpop.f32.mrf.mxu0 }
 0x6d7   :  { %v432_v28 = vadd.f32 %v2131_v26, %v431_v27 }
 0x6d9   :  { %v434_v29 = vadd.f32 %v432_v28, %v2315_v15 }
 0x6db   :  { %v435_v30 = vmax.f32 %v434_v29, 0.0 }
 0x6dd   :  { %2044 = vmatmul.msk.f32.vlgmr.msrb.gmra.mxu2 %vm113_vm2, %v435_v30 }
 0x6de   :  { %669 = vmatpush.msrb.mxu2 %v2258_v2 }
 0x760   :  { %v456_v31 = vpop.f32.mrf.mxu2 }
 0x761   :  { %v457_v32 = vadd.f32 %v2348_v21, %v456_v31  ;;  %v2058_v31 = vld [vmem:[%s2850_s2 + $0xe] sm:$0x3] }
 0x763   :  { %v459_v33 = vmax.f32 %v457_v32, 0.0 }
 0x765   :  { %2045 = vmatmul.msk.f32.vlgmr.msrb.gmra.mxu3 %vm113_vm2, %v459_v33 }
 0x766   :  { %691 = vmatpush.msrb.mxu3 %v2272_v5 }
 0x768   :  { %692 = vmatpush.msrb.mxu3 %v2279_v6 }
 0x76a   :  { %693 = vmatpush.msrb.mxu3 %v2287_v7 }
 0x76c   :  { %694 = vmatpush.msrb.mxu3 %v2295_v8 }
 0x7e8   :  { %v480_v34 = vpop.f32.mrf.mxu3 }
 0x7e9   :  { %v481_v35 = vadd.f32 %v2359_v25, %v480_v34  ;;  %v2135_v34 = vld [vmem:[%s2851_s3 + $0x8] ss:$0 sm:$0xff] }
 0x7eb   :  { %v484_v37 = vmul.f32 0.050639696, %v481_v35 }
 0x7ed   :  { %v485_v39 = vsub.f32 %v483_v36, %v484_v37 }
 0x7ef   :  { %v488_v40 = vadd.f32 %v2046_v38, %v485_v39 }
 0x7f1   :  { %2047 = vmatmul.msk.f32.vlgmr.msra.gmra.mxu1 %vm84_vm1, %v488_v40  ;;  %v563_v51 = vmul.f32 1.0067511, %v488_v40 }
 0x7f2   :  { %715 = vmatpush.msra.mxu1 %v2303_v9 }
 0x7f4   :  { %716 = vmatpush.msra.mxu1 %v2322_v18 }
 0x7f6   :  { %717 = vmatpush.msra.mxu1 %v2329_v19 }
 0x7f8   :  { %718 = vmatpush.msra.mxu1 %v2337_v20 }
 0x86e   :  { %v511_v42 = vpop.f32.mrf.mxu1 }
 0x86f   :  { %v512_v43 = vadd.f32 %v2132_v41, %v511_v42 }
 0x871   :  { %v514_v44 = vadd.f32 %v512_v43, %v2315_v15 }
 0x873   :  { %v515_v45 = vmax.f32 %v514_v44, 0.0 }
 0x875   :  { %2048 = vmatmul.msk.f32.vlgmr.msra.gmra.mxu0 %vm113_vm2, %v515_v45 }
 0x876   :  { %749 = vmatpush.msra.mxu0 %v2258_v2 }
 0x8f2   :  { %v536_v46 = vpop.f32.mrf.mxu0 }
 0x8f3   :  { %v537_v47 = vadd.f32 %v2348_v21, %v536_v46  ;;  %v2062_v46 = vld [vmem:[%s2850_s2 + $0x10] sm:$0x3] }
 0x8f5   :  { %v539_v48 = vmax.f32 %v537_v47, 0.0 }
 0x8f7   :  { %2049 = vmatmul.msk.f32.vlgmr.msra.gmra.mxu2 %vm113_vm2, %v539_v48 }
 0x8f8   :  { %771 = vmatpush.msra.mxu2 %v2272_v5 }
 0x8fa   :  { %772 = vmatpush.msra.mxu2 %v2279_v6 }
 0x8fc   :  { %773 = vmatpush.msra.mxu2 %v2287_v7 }
 0x8fe   :  { %774 = vmatpush.msra.mxu2 %v2295_v8 }
 0x97a   :  { %v560_v49 = vpop.f32.mrf.mxu2 }
 0x97b   :  { %v561_v50 = vadd.f32 %v2359_v25, %v560_v49  ;;  %v2136_v49 = vld [vmem:[%s2851_s3 + $0x9] ss:$0 sm:$0xff] }
 0x97d   :  { %v564_v52 = vmul.f32 0.05021825, %v561_v50 }
 0x97f   :  { %v565_v54 = vsub.f32 %v563_v51, %v564_v52 }
 0x981   :  { %v568_v55 = vadd.f32 %v2050_v53, %v565_v54 }
 0x983   :  { %2051 = vmatmul.msk.f32.vlgmr.msra.gmra.mxu3 %vm84_vm1, %v568_v55  ;;  %v643_v3 = vmul.f32 1.0060749, %v568_v55 }
 0x984   :  { %795 = vmatpush.msra.mxu3 %v2303_v9 }
 0x986   :  { %796 = vmatpush.msra.mxu3 %v2322_v18 }
 0x988   :  { %797 = vmatpush.msra.mxu3 %v2329_v19 }
 0x98a   :  { %798 = vmatpush.msra.mxu3 %v2337_v20 }
 0xa06   :  { %v591_v57 = vpop.f32.mrf.mxu3 }
 0xa07   :  { %v592_v58 = vadd.f32 %v2133_v56, %v591_v57 }
 0xa09   :  { %v594_v59 = vadd.f32 %v592_v58, %v2315_v15 }
 0xa0b   :  { %v595_v60 = vmax.f32 %v594_v59, 0.0 }
 0xa0d   :  { %2052 = vmatmul.msk.f32.vlgmr.msrb.gmra.mxu1 %vm113_vm2, %v595_v60 }
 0xa0e   :  { %829 = vmatpush.msrb.mxu1 %v2258_v2 }
 0xa8a   :  { %v616_v61 = vpop.f32.mrf.mxu1 }
 0xa8b   :  { %v617_v62 = vadd.f32 %v2348_v21, %v616_v61  ;;  %v2066_v61 = vld [vmem:[%s2850_s2 + $0x12] sm:$0x3] }
 0xa8d   :  { %v619_v63 = vmax.f32 %v617_v62, 0.0 }
 0xa8f   :  { %2053 = vmatmul.msk.f32.vlgmr.msrb.gmra.mxu0 %vm113_vm2, %v619_v63 }
 0xa90   :  { %851 = vmatpush.msrb.mxu0 %v2272_v5 }
 0xa92   :  { %852 = vmatpush.msrb.mxu0 %v2279_v6 }
 0xa94   :  { %853 = vmatpush.msrb.mxu0 %v2287_v7 }
 0xa96   :  { %854 = vmatpush.msrb.mxu0 %v2295_v8 }
 0xb0c   :  { %v640_v0 = vpop.f32.mrf.mxu0 }
 0xb0d   :  { %v641_v1 = vadd.f32 %v2359_v25, %v640_v0  ;;  %v2137_v0 = vld [vmem:[%s2851_s3 + $0xa] ss:$0 sm:$0xff] }
 0xb0f   :  { %v644_v4 = vmul.f32 0.04977141, %v641_v1 }
 0xb11   :  { %v645_v11 = vsub.f32 %v643_v3, %v644_v4 }
 0xb13   :  { %v648_v12 = vadd.f32 %v2054_v10, %v645_v11 }
 0xb15   :  { %2055 = vmatmul.msk.f32.vlgmr.msrb.gmra.mxu2 %vm84_vm1, %v648_v12  ;;  %v723_v29 = vmul.f32 1.0054001, %v648_v12 }
 0xb16   :  { %875 = vmatpush.msrb.mxu2 %v2303_v9 }
 0xb18   :  { %876 = vmatpush.msrb.mxu2 %v2322_v18 }
 0xb1a   :  { %877 = vmatpush.msrb.mxu2 %v2329_v19 }
 0xb1c   :  { %878 = vmatpush.msrb.mxu2 %v2337_v20 }
 0xb98   :  { %v671_v14 = vpop.f32.mrf.mxu2 }
 0xb99   :  { %v672_v16 = vadd.f32 %v2134_v13, %v671_v14 }
 0xb9b   :  { %v674_v17 = vadd.f32 %v672_v16, %v2315_v15 }
 0xb9d   :  { %v675_v22 = vmax.f32 %v674_v17, 0.0 }
 0xb9f   :  { %2056 = vmatmul.msk.f32.vlgmr.msrb.gmra.mxu3 %vm113_vm2, %v675_v22 }
 0xba0   :  { %909 = vmatpush.msrb.mxu3 %v2258_v2 }
 0xc22   :  { %v696_v23 = vpop.f32.mrf.mxu3 }
 0xc23   :  { %v697_v24 = vadd.f32 %v2348_v21, %v696_v23  ;;  %v2070_v23 = vld [vmem:[%s2850_s2 + $0x14] sm:$0x3] }
 0xc25   :  { %v699_v26 = vmax.f32 %v697_v24, 0.0 }
 0xc27   :  { %2057 = vmatmul.msk.f32.vlgmr.msra.gmra.mxu1 %vm113_vm2, %v699_v26 }
 0xc28   :  { %931 = vmatpush.msra.mxu1 %v2272_v5 }
 0xc2a   :  { %932 = vmatpush.msra.mxu1 %v2279_v6 }
 0xc2c   :  { %933 = vmatpush.msra.mxu1 %v2287_v7 }
 0xc2e   :  { %934 = vmatpush.msra.mxu1 %v2295_v8 }
 0xca4   :  { %v720_v27 = vpop.f32.mrf.mxu1 }
 0xca5   :  { %v721_v28 = vadd.f32 %v2359_v25, %v720_v27  ;;  %v2138_v27 = vld [vmem:[%s2851_s3 + $0xb] ss:$0 sm:$0xff] }
 0xca7   :  { %v724_v30 = vmul.f32 0.04928334, %v721_v28 }
 0xca9   :  { %v725_v32 = vsub.f32 %v723_v29, %v724_v30 }
 0xcab   :  { %v728_v33 = vadd.f32 %v2058_v31, %v725_v32 }
 0xcad   :  { %2059 = vmatmul.msk.f32.vlgmr.msra.gmra.mxu0 %vm84_vm1, %v728_v33  ;;  %v803_v44 = vmul.f32 1.0047266, %v728_v33 }
 0xcae   :  { %955 = vmatpush.msra.mxu0 %v2303_v9 }
 0xcb0   :  { %956 = vmatpush.msra.mxu0 %v2322_v18 }
 0xcb2   :  { %957 = vmatpush.msra.mxu0 %v2329_v19 }
 0xcb4   :  { %958 = vmatpush.msra.mxu0 %v2337_v20 }
 0xd2a   :  { %v751_v35 = vpop.f32.mrf.mxu0 }
 0xd2b   :  { %v752_v36 = vadd.f32 %v2135_v34, %v751_v35 }
 0xd2d   :  { %v754_v37 = vadd.f32 %v752_v36, %v2315_v15 }
 0xd2f   :  { %v755_v38 = vmax.f32 %v754_v37, 0.0 }
 0xd31   :  { %2060 = vmatmul.msk.f32.vlgmr.msra.gmra.mxu2 %vm113_vm2, %v755_v38 }
 0xd32   :  { %989 = vmatpush.msra.mxu2 %v2258_v2 }
 0xdb4   :  { %v776_v39 = vpop.f32.mrf.mxu2 }
 0xdb5   :  { %v777_v40 = vadd.f32 %v2348_v21, %v776_v39  ;;  %v2074_v39 = vld [vmem:[%s2850_s2 + $0x16] sm:$0x3] }
 0xdb7   :  { %v779_v41 = vmax.f32 %v777_v40, 0.0 }
 0xdb9   :  { %2061 = vmatmul.msk.f32.vlgmr.msra.gmra.mxu3 %vm113_vm2, %v779_v41 }
 0xdba   :  { %1011 = vmatpush.msra.mxu3 %v2272_v5 }
 0xdbc   :  { %1012 = vmatpush.msra.mxu3 %v2279_v6 }
 0xdbe   :  { %1013 = vmatpush.msra.mxu3 %v2287_v7 }
 0xdc0   :  { %1014 = vmatpush.msra.mxu3 %v2295_v8 }
 0xe3c   :  { %v800_v42 = vpop.f32.mrf.mxu3 }
 0xe3d   :  { %v801_v43 = vadd.f32 %v2359_v25, %v800_v42  ;;  %v2139_v42 = vld [vmem:[%s2851_s3 + $0xc] ss:$0 sm:$0xff] }
 0xe3f   :  { %v804_v45 = vmul.f32 0.048731, %v801_v43 }
 0xe41   :  { %v805_v47 = vsub.f32 %v803_v44, %v804_v45 }
 0xe43   :  { %v808_v48 = vadd.f32 %v2062_v46, %v805_v47 }
 0xe45   :  { %2063 = vmatmul.msk.f32.vlgmr.msrb.gmra.mxu1 %vm84_vm1, %v808_v48  ;;  %v883_v59 = vmul.f32 1.0040545, %v808_v48 }
 0xe46   :  { %1035 = vmatpush.msrb.mxu1 %v2303_v9 }
 0xe48   :  { %1036 = vmatpush.msrb.mxu1 %v2322_v18 }
 0xe4a   :  { %1037 = vmatpush.msrb.mxu1 %v2329_v19 }
 0xe4c   :  { %1038 = vmatpush.msrb.mxu1 %v2337_v20 }
 0xec2   :  { %v831_v50 = vpop.f32.mrf.mxu1 }
 0xec3   :  { %v832_v51 = vadd.f32 %v2136_v49, %v831_v50 }
 0xec5   :  { %v834_v52 = vadd.f32 %v832_v51, %v2315_v15 }
 0xec7   :  { %v835_v53 = vmax.f32 %v834_v52, 0.0 }
 0xec9   :  { %2064 = vmatmul.msk.f32.vlgmr.msrb.gmra.mxu0 %vm113_vm2, %v835_v53 }
 0xeca   :  { %1069 = vmatpush.msrb.mxu0 %v2258_v2 }
 0xf46   :  { %v856_v54 = vpop.f32.mrf.mxu0 }
 0xf47   :  { %v857_v55 = vadd.f32 %v2348_v21, %v856_v54  ;;  %v2078_v54 = vld [vmem:[%s2850_s2 + $0x18] sm:$0x3] }
 0xf49   :  { %v859_v56 = vmax.f32 %v857_v55, 0.0 }
 0xf4b   :  { %2065 = vmatmul.msk.f32.vlgmr.msrb.gmra.mxu2 %vm113_vm2, %v859_v56 }
 0xf4c   :  { %1091 = vmatpush.msrb.mxu2 %v2272_v5 }
 0xf4e   :  { %1092 = vmatpush.msrb.mxu2 %v2279_v6 }
 0xf50   :  { %1093 = vmatpush.msrb.mxu2 %v2287_v7 }
 0xf52   :  { %1094 = vmatpush.msrb.mxu2 %v2295_v8 }
 0xfce   :  { %v880_v57 = vpop.f32.mrf.mxu2 }
 0xfcf   :  { %v881_v58 = vadd.f32 %v2359_v25, %v880_v57  ;;  %v2140_v57 = vld [vmem:[%s2851_s3 + $0xd] ss:$0 sm:$0xff] }
 0xfd1   :  { %v884_v60 = vmul.f32 0.04807692, %v881_v58 }
 0xfd3   :  { %v885_v62 = vsub.f32 %v883_v59, %v884_v60 }
 0xfd5   :  { %v888_v63 = vadd.f32 %v2066_v61, %v885_v62 }
 0xfd7   :  { %2067 = vmatmul.msk.f32.vlgmr.msrb.gmra.mxu3 %vm84_vm1, %v888_v63  ;;  %v963_v17 = vmul.f32 1.0033838, %v888_v63 }
 0xfd8   :  { %1115 = vmatpush.msrb.mxu3 %v2303_v9 }
 0xfda   :  { %1116 = vmatpush.msrb.mxu3 %v2322_v18 }
 0xfdc   :  { %1117 = vmatpush.msrb.mxu3 %v2329_v19 }
 0xfde   :  { %1118 = vmatpush.msrb.mxu3 %v2337_v20 }
0x105a   :  { %v911_v1 = vpop.f32.mrf.mxu3 }
0x105b   :  { %v912_v3 = vadd.f32 %v2137_v0, %v911_v1 }
0x105d   :  { %v914_v4 = vadd.f32 %v912_v3, %v2315_v15 }
0x105f   :  { %v915_v10 = vmax.f32 %v914_v4, 0.0 }
0x1061   :  { %2068 = vmatmul.msk.f32.vlgmr.msra.gmra.mxu1 %vm113_vm2, %v915_v10 }
0x1062   :  { %1149 = vmatpush.msra.mxu1 %v2258_v2 }
0x10de   :  { %v936_v11 = vpop.f32.mrf.mxu1 }
0x10df   :  { %v937_v12 = vadd.f32 %v2348_v21, %v936_v11  ;;  %v2082_v11 = vld [vmem:[%s2850_s2 + $0x1a] sm:$0x3] }
0x10e1   :  { %v939_v13 = vmax.f32 %v937_v12, 0.0 }
0x10e3   :  { %2069 = vmatmul.msk.f32.vlgmr.msra.gmra.mxu0 %vm113_vm2, %v939_v13 }
0x10e4   :  { %1171 = vmatpush.msra.mxu0 %v2272_v5 }
0x10e6   :  { %1172 = vmatpush.msra.mxu0 %v2279_v6 }
0x10e8   :  { %1173 = vmatpush.msra.mxu0 %v2287_v7 }
0x10ea   :  { %1174 = vmatpush.msra.mxu0 %v2295_v8 }
0x1160   :  { %v960_v14 = vpop.f32.mrf.mxu0 }
0x1161   :  { %v961_v16 = vadd.f32 %v2359_v25, %v960_v14  ;;  %v2141_v14 = vld [vmem:[%s2851_s3 + $0xe] ss:$0 sm:$0xff] }
0x1163   :  { %v964_v22 = vmul.f32 0.047257405, %v961_v16 }
0x1165   :  { %v965_v24 = vsub.f32 %v963_v17, %v964_v22 }
0x1167   :  { %v968_v26 = vadd.f32 %v2070_v23, %v965_v24 }
0x1169   :  { %2071 = vmatmul.msk.f32.vlgmr.msra.gmra.mxu2 %vm84_vm1, %v968_v26  ;;  %v1043_v37 = vmul.f32 1.0027144, %v968_v26 }
0x116a   :  { %1195 = vmatpush.msra.mxu2 %v2303_v9 }
0x116c   :  { %1196 = vmatpush.msra.mxu2 %v2322_v18 }
0x116e   :  { %1197 = vmatpush.msra.mxu2 %v2329_v19 }
0x1170   :  { %1198 = vmatpush.msra.mxu2 %v2337_v20 }
0x11ec   :  { %v991_v28 = vpop.f32.mrf.mxu2 }
0x11ed   :  { %v992_v29 = vadd.f32 %v2138_v27, %v991_v28 }
0x11ef   :  { %v994_v30 = vadd.f32 %v992_v29, %v2315_v15 }
0x11f1   :  { %v995_v31 = vmax.f32 %v994_v30, 0.0 }
0x11f3   :  { %2072 = vmatmul.msk.f32.vlgmr.msra.gmra.mxu3 %vm113_vm2, %v995_v31 }
0x11f4   :  { %1229 = vmatpush.msra.mxu3 %v2258_v2 }
0x1276   :  { %v1016_v32 = vpop.f32.mrf.mxu3 }
0x1277   :  { %v1017_v33 = vadd.f32 %v2348_v21, %v1016_v32  ;;  %v2086_v32 = vld [vmem:[%s2850_s2 + $0x1c] sm:$0x3] }
0x1279   :  { %v1019_v34 = vmax.f32 %v1017_v33, 0.0 }
0x127b   :  { %2073 = vmatmul.msk.f32.vlgmr.msrb.gmra.mxu1 %vm113_vm2, %v1019_v34 }
0x127c   :  { %1251 = vmatpush.msrb.mxu1 %v2272_v5 }
0x127e   :  { %1252 = vmatpush.msrb.mxu1 %v2279_v6 }
0x1280   :  { %1253 = vmatpush.msrb.mxu1 %v2287_v7 }
0x1282   :  { %1254 = vmatpush.msrb.mxu1 %v2295_v8 }
0x12f8   :  { %v1040_v35 = vpop.f32.mrf.mxu1 }
0x12f9   :  { %v1041_v36 = vadd.f32 %v2359_v25, %v1040_v35  ;;  %v2142_v35 = vld [vmem:[%s2851_s3 + $0xf] ss:$0 sm:$0xff] }
0x12fb   :  { %v1044_v38 = vmul.f32 0.046152372, %v1041_v36 }
0x12fd   :  { %v1045_v40 = vsub.f32 %v1043_v37, %v1044_v38 }
0x12ff   :  { %v1048_v41 = vadd.f32 %v2074_v39, %v1045_v40 }
0x1301   :  { %2075 = vmatmul.msk.f32.vlgmr.msrb.gmra.mxu0 %vm84_vm1, %v1048_v41  ;;  %v1123_v52 = vmul.f32 1.0020462, %v1048_v41 }
0x1302   :  { %1275 = vmatpush.msrb.mxu0 %v2303_v9 }
0x1304   :  { %1276 = vmatpush.msrb.mxu0 %v2322_v18 }
0x1306   :  { %1277 = vmatpush.msrb.mxu0 %v2329_v19 }
0x1308   :  { %1278 = vmatpush.msrb.mxu0 %v2337_v20 }
0x137e   :  { %v1071_v43 = vpop.f32.mrf.mxu0 }
0x137f   :  { %v1072_v44 = vadd.f32 %v2139_v42, %v1071_v43 }
0x1381   :  { %v1074_v45 = vadd.f32 %v1072_v44, %v2315_v15 }
0x1383   :  { %v1075_v46 = vmax.f32 %v1074_v45, 0.0 }
0x1385   :  { %2076 = vmatmul.msk.f32.vlgmr.msrb.gmra.mxu2 %vm113_vm2, %v1075_v46 }
0x1386   :  { %1309 = vmatpush.msrb.mxu2 %v2258_v2 }
0x1408   :  { %v1096_v47 = vpop.f32.mrf.mxu2 }
0x1409   :  { %v1097_v48 = vadd.f32 %v2348_v21, %v1096_v47 }
0x140b   :  { %v1099_v49 = vmax.f32 %v1097_v48, 0.0 }
0x140d   :  { %2077 = vmatmul.msk.f32.vlgmr.msrb.gmra.mxu3 %vm113_vm2, %v1099_v49  ;;  %v2143_v49 = vld [vmem:[%s2851_s3 + $0x10] ss:$0 sm:$0xff] }
0x140e   :  { %1331 = vmatpush.msrb.mxu3 %v2272_v5 }
0x1410   :  { %1332 = vmatpush.msrb.mxu3 %v2279_v6 }
0x1412   :  { %1333 = vmatpush.msrb.mxu3 %v2287_v7 }
0x1414   :  { %1334 = vmatpush.msrb.mxu3 %v2295_v8 }
0x1490   :  { %v1120_v50 = vpop.f32.mrf.mxu3 }
0x1491   :  { %v1121_v51 = vadd.f32 %v2359_v25, %v1120_v50 }
0x1493   :  { %v1124_v53 = vmul.f32 0.044508554, %v1121_v51 }
0x1495   :  { %v1125_v55 = vsub.f32 %v1123_v52, %v1124_v53 }
0x1497   :  { %v1128_v56 = vadd.f32 %v2078_v54, %v1125_v55  ;;  %v2693_v54 = vld [vmem:[%s2852_s4] sm:$0xff]  ;;  %s2018_s4 = sshll.u32 %s2859_s11, 4  ;;  %s2019_s4 = int_to_ptr.hbm [resolvable:$true] %s2018_s4 }
0x1499   :  { %2079 = vmatmul.msk.f32.vlgmr.msra.gmra.mxu1 %vm84_vm1, %v1128_v56  ;;  %v1203_v4 = vmul.f32 1.0013795, %v1128_v56 }
0x149a   :  { %1355 = vmatpush.msra.mxu1 %v2303_v9 }
0x149c   :  { %1356 = vmatpush.msra.mxu1 %v2322_v18 }
0x149e   :  { %1357 = vmatpush.msra.mxu1 %v2329_v19 }
0x14a0   :  { %1358 = vmatpush.msra.mxu1 %v2337_v20 }
0x1516   :  { %v1151_v58 = vpop.f32.mrf.mxu1 }
0x1517   :  { %v1152_v59 = vadd.f32 %v2140_v57, %v1151_v58 }
0x1519   :  { %v1154_v60 = vadd.f32 %v1152_v59, %v2315_v15 }
0x151b   :  { %v1155_v61 = vmax.f32 %v1154_v60, 0.0 }
0x151d   :  { %2080 = vmatmul.msk.f32.vlgmr.msra.gmra.mxu0 %vm113_vm2, %v1155_v61 }
0x151e   :  { %1389 = vmatpush.msra.mxu0 %v2258_v2 }
0x159a   :  { %v1176_v62 = vpop.f32.mrf.mxu0 }
0x159b   :  { %v1177_v63 = vadd.f32 %v2348_v21, %v1176_v62  ;;  %v2094_v62 = vld [vmem:[%s2850_s2 + $0x20] sm:$0x3] }
0x159d   :  { %v1179_v0 = vmax.f32 %v1177_v63, 0.0 }
0x159f   :  { %2081 = vmatmul.msk.f32.vlgmr.msra.gmra.mxu2 %vm113_vm2, %v1179_v0 }
0x15a0   :  { %1411 = vmatpush.msra.mxu2 %v2272_v5 }
0x15a2   :  { %1412 = vmatpush.msra.mxu2 %v2279_v6 }
0x15a4   :  { %1413 = vmatpush.msra.mxu2 %v2287_v7 }
0x15a6   :  { %1414 = vmatpush.msra.mxu2 %v2295_v8 }
0x1622   :  { %v1200_v1 = vpop.f32.mrf.mxu2 }
0x1623   :  { %v1201_v3 = vadd.f32 %v2359_v25, %v1200_v1  ;;  %v2144_v1 = vld [vmem:[%s2851_s3 + $0x11] ss:$0 sm:$0xff] }
0x1625   :  { %v1204_v10 = vmul.f32 0.04168291, %v1201_v3 }
0x1627   :  { %v1205_v12 = vsub.f32 %v1203_v4, %v1204_v10 }
0x1629   :  { %v1208_v13 = vadd.f32 %v2082_v11, %v1205_v12 }
0x162b   :  { %2083 = vmatmul.msk.f32.vlgmr.msra.gmra.mxu3 %vm84_vm1, %v1208_v13  ;;  %v1283_v30 = vmul.f32 1.0007141, %v1208_v13 }
0x162c   :  { %1435 = vmatpush.msra.mxu3 %v2303_v9 }
0x162e   :  { %1436 = vmatpush.msra.mxu3 %v2322_v18 }
0x1630   :  { %1437 = vmatpush.msra.mxu3 %v2329_v19 }
0x1632   :  { %1438 = vmatpush.msra.mxu3 %v2337_v20 }
0x16ae   :  { %v1231_v16 = vpop.f32.mrf.mxu3 }
0x16af   :  { %v1232_v17 = vadd.f32 %v2141_v14, %v1231_v16 }
0x16b1   :  { %v1234_v22 = vadd.f32 %v1232_v17, %v2315_v15 }
0x16b3   :  { %v1235_v23 = vmax.f32 %v1234_v22, 0.0 }
0x16b5   :  { %2084 = vmatmul.msk.f32.vlgmr.msrb.gmra.mxu1 %vm113_vm2, %v1235_v23 }
0x16b6   :  { %1469 = vmatpush.msrb.mxu1 %v2258_v2 }
0x1732   :  { %v1256_v24 = vpop.f32.mrf.mxu1 }
0x1733   :  { %v1257_v26 = vadd.f32 %v2348_v21, %v1256_v24  ;;  %v2098_v24 = vld [vmem:[%s2850_s2 + $0x22] sm:$0x3] }
0x1735   :  { %v1259_v27 = vmax.f32 %v1257_v26, 0.0 }
0x1737   :  { %2085 = vmatmul.msk.f32.vlgmr.msrb.gmra.mxu0 %vm113_vm2, %v1259_v27 }
0x1738   :  { %1491 = vmatpush.msrb.mxu0 %v2272_v5 }
0x173a   :  { %1492 = vmatpush.msrb.mxu0 %v2279_v6 }
0x173c   :  { %1493 = vmatpush.msrb.mxu0 %v2287_v7 }
0x173e   :  { %1494 = vmatpush.msrb.mxu0 %v2295_v8 }
0x17b4   :  { %v1280_v28 = vpop.f32.mrf.mxu0 }
0x17b5   :  { %v1281_v29 = vadd.f32 %v2359_v25, %v1280_v28 }
0x17b7   :  { %v1284_v31 = vmul.f32 0.03540084, %v1281_v29 }
0x17b9   :  { %v1285_v33 = vsub.f32 %v1283_v30, %v1284_v31  ;;  %v2154_v30 = vld [vmem:[%s2855_s7 + $0x8] sm:$0xff] }
0x17bb   :  { %v1288_v34 = vadd.f32 %v2086_v32, %v1285_v33 }
0x17bd   :  { %2087 = vmatmul.msk.f32.vlgmr.msrb.gmra.mxu2 %vm84_vm1, %v1288_v34  ;;  %v1363_v45 = vmul.f32 1.0000501, %v1288_v34 }
0x17be   :  { %1515 = vmatpush.msrb.mxu2 %v2303_v9 }
0x17c0   :  { %1516 = vmatpush.msrb.mxu2 %v2322_v18 }
0x17c2   :  { %1517 = vmatpush.msrb.mxu2 %v2329_v19 }
0x17c4   :  { %1518 = vmatpush.msrb.mxu2 %v2337_v20 }
0x1840   :  { %v1311_v36 = vpop.f32.mrf.mxu2 }
0x1841   :  { %v1312_v37 = vadd.f32 %v2142_v35, %v1311_v36  ;;  %v2102_v35 = vld [vmem:[%s2850_s2 + $0x24] sm:$0x3] }
0x1843   :  { %v1314_v38 = vadd.f32 %v1312_v37, %v2315_v15 }
0x1845   :  { %v1315_v39 = vmax.f32 %v1314_v38, 0.0  ;;  %v2156_v38 = vld [vmem:[%s2857_s9 + $0x18] sm:$0xff] }
0x1847   :  { %2088 = vmatmul.msk.f32.vlgmr.msrb.gmra.mxu3 %vm113_vm2, %v1315_v39  ;;  %v2157_v39 = vld [vmem:[%s2857_s9 + $0x10] sm:$0xff] }
0x1848   :  { %1549 = vmatpush.msrb.mxu3 %v2258_v2  ;;  %v2090_v2 = vld [vmem:[%s2850_s2 + $0x1e] sm:$0x3] }
0x18ca   :  { %v1336_v40 = vpop.f32.mrf.mxu3 }
0x18cb   :  { %v1337_v41 = vadd.f32 %v2348_v21, %v1336_v40  ;;  %v2159_v40 = vld [vmem:[%s2857_s9] sm:$0xff] }
0x18cd   :  { %v1339_v42 = vmax.f32 %v1337_v41, 0.0  ;;  %v2146_v41 = vld [vmem:[%s2851_s3 + $0x13] ss:$0 sm:$0xff] }
0x18cf   :  { %2089 = vmatmul.msk.f32.vlgmr.msra.gmra.mxu1 %vm113_vm2, %v1339_v42 }
0x18d0   :  { %1571 = vmatpush.msra.mxu1 %v2272_v5 }
0x18d2   :  { %1572 = vmatpush.msra.mxu1 %v2279_v6 }
0x18d4   :  { %1573 = vmatpush.msra.mxu1 %v2287_v7 }
0x18d6   :  { %1574 = vmatpush.msra.mxu1 %v2295_v8 }
0x194c   :  { %v1360_v43 = vpop.f32.mrf.mxu1 }
0x194d   :  { %v1361_v44 = vadd.f32 %v2359_v25, %v1360_v43 }
0x194f   :  { %v1364_v46 = vmul.f32 0.0070720087, %v1361_v44 }
0x1951   :  { %v1365_v47 = vsub.f32 %v1363_v45, %v1364_v46 }
0x1953   :  { %v1368_v48 = vadd.f32 %v2090_v2, %v1365_v47  ;;  %v2781_v2 = vld [vmem:[%s2856_s8] ss:$0 sm:$0xff] }
0x1955   :  { %2091 = vmatmul.msk.f32.vlgmr.msra.gmra.mxu0 %vm84_vm1, %v1368_v48  ;;  %v1443_v60 = vmul.f32 1.0000501, %v1368_v48 }
0x1956   :  { %1595 = vmatpush.msra.mxu0 %v2303_v9 }
0x1958   :  { %1596 = vmatpush.msra.mxu0 %v2322_v18 }
0x195a   :  { %1597 = vmatpush.msra.mxu0 %v2329_v19 }
0x195c   :  { %1598 = vmatpush.msra.mxu0 %v2337_v20 }
0x19d2   :  { %v1391_v50 = vpop.f32.mrf.mxu0 }
0x19d3   :  { %v1392_v51 = vadd.f32 %v2143_v49, %v1391_v50  ;;  %v2789_v50 = vld [vmem:[%s2858_s10] ss:$0 sm:$0xff] }
0x19d5   :  { %v1394_v52 = vadd.f32 %v1392_v51, %v2315_v15 }
0x19d7   :  { %v1395_v53 = vmax.f32 %v1394_v52, 0.0 }
0x19d9   :  { %2092 = vmatmul.msk.f32.vlgmr.msra.gmra.mxu2 %vm113_vm2, %v1395_v53 }
0x19da   :  { %1629 = vmatpush.msra.mxu2 %v2693_v54 }
0x1a5c   :  { %v1416_v55 = vpop.f32.mrf.mxu2 }
0x1a5d   :  { %v1417_v56 = vadd.f32 %v2348_v21, %v1416_v55  ;;  %v2106_v55 = vld [vmem:[%s2850_s2 + $0x26] sm:$0x3] }
0x1a5f   :  { %v1419_v57 = vmax.f32 %v1417_v56, 0.0 }
0x1a61   :  { %2093 = vmatmul.msk.f32.vlgmr.msra.gmra.mxu3 %vm113_vm2, %v1419_v57 }
0x1a62   :  { %1651 = vmatpush.msra.mxu3 %v2272_v5 }
0x1a64   :  { %1652 = vmatpush.msra.mxu3 %v2279_v6 }
0x1a66   :  { %1653 = vmatpush.msra.mxu3 %v2287_v7 }
0x1a68   :  { %1654 = vmatpush.msra.mxu3 %v2295_v8 }
0x1ae4   :  { %v1440_v58 = vpop.f32.mrf.mxu3 }
0x1ae5   :  { %v1441_v59 = vadd.f32 %v2359_v25, %v1440_v58  ;;  %v2147_v58 = vld [vmem:[%s2851_s3 + $0x14] ss:$0 sm:$0xff] }
0x1ae7   :  { %v1444_v61 = vmul.f32 0.0070720087, %v1441_v59 }
0x1ae9   :  { %v1445_v63 = vsub.f32 %v1443_v60, %v1444_v61 }
0x1aeb   :  { %v1448_v0 = vadd.f32 %v2094_v62, %v1445_v63 }
0x1aed   :  { %2095 = vmatmul.msk.f32.vlgmr.msrb.gmra.mxu1 %vm84_vm1, %v1448_v0  ;;  %v1523_v22 = vmul.f32 1.0000501, %v1448_v0 }
0x1aee   :  { %1675 = vmatpush.msrb.mxu1 %v2303_v9 }
0x1af0   :  { %1676 = vmatpush.msrb.mxu1 %v2322_v18 }
0x1af2   :  { %1677 = vmatpush.msrb.mxu1 %v2329_v19 }
0x1af4   :  { %1678 = vmatpush.msrb.mxu1 %v2337_v20 }
0x1b6a   :  { %v1471_v3 = vpop.f32.mrf.mxu1 }
0x1b6b   :  { %v1472_v4 = vadd.f32 %v2144_v1, %v1471_v3 }
0x1b6d   :  { %v1474_v10 = vadd.f32 %v1472_v4, %v2315_v15 }
0x1b6f   :  { %v1475_v11 = vmax.f32 %v1474_v10, 0.0 }
0x1b71   :  { %2096 = vmatmul.msk.f32.vlgmr.msrb.gmra.mxu0 %vm113_vm2, %v1475_v11 }
0x1b72   :  { %1709 = vmatpush.msrb.mxu0 %v2693_v54 }
0x1bee   :  { %v1496_v12 = vpop.f32.mrf.mxu0 }
0x1bef   :  { %v1497_v13 = vadd.f32 %v2348_v21, %v1496_v12 }
0x1bf1   :  { %v1499_v14 = vmax.f32 %v1497_v13, 0.0 }
0x1bf3   :  { %2097 = vmatmul.msk.f32.vlgmr.msrb.gmra.mxu2 %vm113_vm2, %v1499_v14  ;;  %v2148_v14 = vld [vmem:[%s2851_s3 + $0x15] ss:$0 sm:$0xff] }
0x1bf4   :  { %1731 = vmatpush.msrb.mxu2 %v2272_v5  ;;  %v2145_v5 = vld [vmem:[%s2851_s3 + $0x12] ss:$0 sm:$0xff] }
0x1bf6   :  { %1732 = vmatpush.msrb.mxu2 %v2279_v6 }
0x1bf8   :  { %1733 = vmatpush.msrb.mxu2 %v2287_v7 }
0x1bfa   :  { %1734 = vmatpush.msrb.mxu2 %v2295_v8 }
0x1c76   :  { %v1520_v16 = vpop.f32.mrf.mxu2 }
0x1c77   :  { %v1521_v17 = vadd.f32 %v2359_v25, %v1520_v16 }
0x1c79   :  { %v1524_v23 = vmul.f32 0.0070720087, %v1521_v17 }
0x1c7b   :  { %v1525_v26 = vsub.f32 %v1523_v22, %v1524_v23 }
0x1c7d   :  { %v1528_v27 = vadd.f32 %v2098_v24, %v1525_v26 }
0x1c7f   :  { %2099 = vmatmul.msk.f32.vlgmr.msrb.gmra.mxu3 %vm84_vm1, %v1528_v27  ;;  %v1603_v33 = vmul.f32 1.0000501, %v1528_v27 }
0x1c80   :  { %1755 = vmatpush.msrb.mxu3 %v2303_v9 }
0x1c82   :  { %1756 = vmatpush.msrb.mxu3 %v2322_v18 }
0x1c84   :  { %1757 = vmatpush.msrb.mxu3 %v2329_v19  ;;  %v2743_v19 = vld [vmem:[%s2855_s7 + $0x18] sm:$0xff] }
0x1c86   :  { %1758 = vmatpush.msrb.mxu3 %v2337_v20  ;;  %v2153_v20 = vld [vmem:[%s2855_s7 + $0x10] sm:$0xff] }
0x1d02   :  { %v1551_v6 = vpop.f32.mrf.mxu3 }
0x1d03   :  { %v1552_v7 = vadd.f32 %v2145_v5, %v1551_v6 }
0x1d05   :  { %v1554_v8 = vadd.f32 %v1552_v7, %v2315_v15 }
0x1d07   :  { %v1555_v28 = vmax.f32 %v1554_v8, 0.0 }
0x1d09   :  { %2100 = vmatmul.msk.f32.vlgmr.msra.gmra.mxu1 %vm113_vm2, %v1555_v28  ;;  %v2114_v28 = vld [vmem:[%s2850_s2 + $0x2a] sm:$0x3] }
0x1d0a   :  { %1789 = vmatpush.msra.mxu1 %v2693_v54 }
0x1d86   :  { %v1576_v9 = vpop.f32.mrf.mxu1 }
0x1d87   :  { %v1577_v18 = vadd.f32 %v2348_v21, %v1576_v9  ;;  %v2155_v21 = vld [vmem:[%s2855_s7] sm:$0xff] }
0x1d89   :  { %v1579_v29 = vmax.f32 %v1577_v18, 0.0 }
0x1d8b   :  { %2101 = vmatmul.msk.f32.vlgmr.msra.gmra.mxu0 %vm113_vm2, %v1579_v29  ;;  %v2149_v29 = vld [vmem:[%s2851_s3 + $0x16] ss:$0 sm:$0xff] }
0x1d8c   :  { %1811 = vmatpush.msra.mxu0 %v2743_v19 }
0x1d8e   :  { %1812 = vmatpush.msra.mxu0 %v2153_v20 }
0x1d90   :  { %1813 = vmatpush.msra.mxu0 %v2154_v30 }
0x1d92   :  { %1814 = vmatpush.msra.mxu0 %v2155_v21 }
0x1e08   :  { %v1600_v31 = vpop.f32.mrf.mxu0 }
0x1e09   :  { %v1601_v32 = vadd.f32 %v2359_v25, %v1600_v31  ;;  %v2158_v25 = vld [vmem:[%s2857_s9 + $0x8] sm:$0xff] }
0x1e0b   :  { %v1604_v34 = vmul.f32 0.0070720087, %v1601_v32 }
0x1e0d   :  { %v1605_v36 = vsub.f32 %v1603_v33, %v1604_v34 }
0x1e0f   :  { %v1608_v37 = vadd.f32 %v2102_v35, %v1605_v36 }
0x1e11   :  { %2103 = vmatmul.msk.f32.vlgmr.msra.gmra.mxu2 %vm84_vm1, %v1608_v37  ;;  %v1683_v52 = vmul.f32 1.0000501, %v1608_v37 }
0x1e12   :  { %1835 = vmatpush.msra.mxu2 %v2156_v38 }
0x1e14   :  { %1836 = vmatpush.msra.mxu2 %v2157_v39 }
0x1e16   :  { %1837 = vmatpush.msra.mxu2 %v2158_v25 }
0x1e18   :  { %1838 = vmatpush.msra.mxu2 %v2159_v40 }
0x1e94   :  { %v1631_v42 = vpop.f32.mrf.mxu2 }
0x1e95   :  { %v1632_v43 = vadd.f32 %v2146_v41, %v1631_v42 }
0x1e97   :  { %v1634_v44 = vadd.f32 %v1632_v43, %v2315_v15 }
0x1e99   :  { %v1635_v45 = vmax.f32 %v1634_v44, 0.0 }
0x1e9b   :  { %2104 = vmatmul.msk.f32.vlgmr.msra.gmra.mxu3 %vm113_vm2, %v1635_v45 }
0x1e9c   :  { %1869 = vmatpush.msra.mxu3 %v2693_v54 }
0x1f1e   :  { %v1656_v46 = vpop.f32.mrf.mxu3 }
0x1f1f   :  { %v1657_v47 = vadd.f32 %v2781_v2, %v1656_v46 }
0x1f21   :  { %v1659_v48 = vmax.f32 %v1657_v47, 0.0 }
0x1f23   :  { %2105 = vmatmul.msk.f32.vlgmr.msrb.gmra.mxu1 %vm113_vm2, %v1659_v48 }
0x1f24   :  { %1891 = vmatpush.msrb.mxu1 %v2743_v19 }
0x1f26   :  { %1892 = vmatpush.msrb.mxu1 %v2153_v20 }
0x1f28   :  { %1893 = vmatpush.msrb.mxu1 %v2154_v30 }
0x1f2a   :  { %1894 = vmatpush.msrb.mxu1 %v2155_v21 }
0x1fa0   :  { %v1680_v49 = vpop.f32.mrf.mxu1 }
0x1fa1   :  { %v1681_v51 = vadd.f32 %v2789_v50, %v1680_v49 }
0x1fa3   :  { %v1684_v53 = vmul.f32 0.0070720087, %v1681_v51 }
0x1fa5   :  { %v1685_v56 = vsub.f32 %v1683_v52, %v1684_v53  ;;  %v2122_v53 = vld [vmem:[%s2850_s2 + $0x2e] sm:$0x3] }
0x1fa7   :  { %v1688_v57 = vadd.f32 %v2106_v55, %v1685_v56 }
0x1fa9   :  { %2107 = vmatmul.msk.f32.vlgmr.msrb.gmra.mxu0 %vm84_vm1, %v1688_v57  ;;  %v1763_v10 = vmul.f32 1.0000501, %v1688_v57 }
0x1faa   :  { %1915 = vmatpush.msrb.mxu0 %v2156_v38 }
0x1fac   :  { %1916 = vmatpush.msrb.mxu0 %v2157_v39 }
0x1fae   :  { %1917 = vmatpush.msrb.mxu0 %v2158_v25 }
0x1fb0   :  { %1918 = vmatpush.msrb.mxu0 %v2159_v40 }
0x2026   :  { %v1711_v59 = vpop.f32.mrf.mxu0 }
0x2027   :  { %v1712_v60 = vadd.f32 %v2147_v58, %v1711_v59 }
0x2029   :  { %v1714_v61 = vadd.f32 %v1712_v60, %v2315_v15 }
0x202b   :  { %v1715_v62 = vmax.f32 %v1714_v61, 0.0 }
0x202d   :  { %2108 = vmatmul.msk.f32.vlgmr.msrb.gmra.mxu2 %vm113_vm2, %v1715_v62 }
0x202e   :  { %1949 = vmatpush.msrb.mxu2 %v2693_v54  ;;  %v2110_v54 = vld [vmem:[%s2850_s2 + $0x28] sm:$0x3] }
0x20b0   :  { %v1736_v63 = vpop.f32.mrf.mxu2 }
0x20b1   :  { %v1737_v0 = vadd.f32 %v2781_v2, %v1736_v63 }
0x20b3   :  { %v1739_v1 = vmax.f32 %v1737_v0, 0.0 }
0x20b5   :  { %2109 = vmatmul.msk.f32.vlgmr.msrb.gmra.mxu3 %vm113_vm2, %v1739_v1 }
0x20b6   :  { %1971 = vmatpush.msrb.mxu3 %v2743_v19 }
0x20b8   :  { %1972 = vmatpush.msrb.mxu3 %v2153_v20 }
0x20ba   :  { %1973 = vmatpush.msrb.mxu3 %v2154_v30 }
0x20bc   :  { %1974 = vmatpush.msrb.mxu3 %v2155_v21 }
0x2138   :  { %v1760_v3 = vpop.f32.mrf.mxu3 }
0x2139   :  { %v1761_v4 = vadd.f32 %v2789_v50, %v1760_v3 }
0x213b   :  { %v1764_v11 = vmul.f32 0.0070720087, %v1761_v4 }
0x213d   :  { %v1765_v12 = vsub.f32 %v1763_v10, %v1764_v11 }
0x213f   :  { %v1768_v13 = vadd.f32 %v2110_v54, %v1765_v12 }
0x2141   :  { %2111 = vmatmul.msk.f32.vlgmr.msra.gmra.mxu1 %vm84_vm1, %v1768_v13  ;;  %v1843_v7 = vmul.f32 1.0000501, %v1768_v13 }
0x2142   :  { %1995 = vmatpush.msra.mxu1 %v2156_v38  ;;  %v2118_v38 = vld [vmem:[%s2850_s2 + $0x2c] sm:$0x3] }
0x2144   :  { %1996 = vmatpush.msra.mxu1 %v2157_v39 }
0x2146   :  { %1997 = vmatpush.msra.mxu1 %v2158_v25 }
0x2148   :  { %1998 = vmatpush.msra.mxu1 %v2159_v40  ;;  %v2150_v40 = vld [vmem:[%s2851_s3 + $0x17] ss:$0 sm:$0xff] }
0x21be   :  { %v1791_v16 = vpop.f32.mrf.mxu1 }
0x21bf   :  { %v1792_v17 = vadd.f32 %v2148_v14, %v1791_v16 }
0x21c1   :  { %v1794_v22 = vadd.f32 %v1792_v17, %v2315_v15 }
0x21c3   :  { %v1795_v23 = vmax.f32 %v1794_v22, 0.0 }
0x21c5   :  { %2112 = vmatmul.msk.f32.vlgmr.msra.gmra.mxu0 %vm113_vm2, %v1795_v23 }
0x2242   :  { %v1816_v24 = vpop.f32.mrf.mxu0 }
0x2243   :  { %v1817_v26 = vadd.f32 %v2781_v2, %v1816_v24 }
0x2245   :  { %v1819_v27 = vmax.f32 %v1817_v26, 0.0 }
0x2247   :  { %2113 = vmatmul.msk.f32.vlgmr.msra.gmra.mxu2 %vm113_vm2, %v1819_v27 }
0x22ca   :  { %v1840_v5 = vpop.f32.mrf.mxu2 }
0x22cb   :  { %v1841_v6 = vadd.f32 %v2789_v50, %v1840_v5 }
0x22cd   :  { %v1844_v8 = vmul.f32 0.0070720087, %v1841_v6 }
0x22cf   :  { %v1845_v9 = vsub.f32 %v1843_v7, %v1844_v8 }
0x22d1   :  { %v1848_v18 = vadd.f32 %v2114_v28, %v1845_v9 }
0x22d3   :  { %2115 = vmatmul.msk.f32.vlgmr.msra.gmra.mxu3 %vm84_vm1, %v1848_v18  ;;  %v1923_v36 = vmul.f32 1.0000501, %v1848_v18 }
0x2356   :  { %v1871_v19 = vpop.f32.mrf.mxu3 }
0x2357   :  { %v1872_v20 = vadd.f32 %v2149_v29, %v1871_v19 }
0x2359   :  { %v1874_v30 = vadd.f32 %v1872_v20, %v2315_v15 }
0x235b   :  { %v1875_v21 = vmax.f32 %v1874_v30, 0.0 }
0x235d   :  { %2116 = vmatmul.msk.f32.vlgmr.msrb.gmra.mxu1 %vm113_vm2, %v1875_v21 }
0x23da   :  { %v1896_v31 = vpop.f32.mrf.mxu1 }
0x23db   :  { %v1897_v32 = vadd.f32 %v2781_v2, %v1896_v31 }
0x23dd   :  { %v1899_v33 = vmax.f32 %v1897_v32, 0.0 }
0x23df   :  { %2117 = vmatmul.msk.f32.vlgmr.msrb.gmra.mxu0 %vm113_vm2, %v1899_v33 }
0x245c   :  { %v1920_v34 = vpop.f32.mrf.mxu0 }
0x245d   :  { %v1921_v35 = vadd.f32 %v2789_v50, %v1920_v34 }
0x245f   :  { %v1924_v37 = vmul.f32 0.0070720087, %v1921_v35 }
0x2461   :  { %v1925_v39 = vsub.f32 %v1923_v36, %v1924_v37 }
0x2463   :  { %v1928_v25 = vadd.f32 %v2118_v38, %v1925_v39 }
0x2465   :  { %2119 = vmatmul.msk.f32.vlgmr.msrb.gmra.mxu2 %vm84_vm1, %v1928_v25  ;;  %v2003_v51 = vmul.f32 1.0000501, %v1928_v25 }
0x24e8   :  { %v1951_v41 = vpop.f32.mrf.mxu2 }
0x24e9   :  { %v1952_v42 = vadd.f32 %v2150_v40, %v1951_v41 }
0x24eb   :  { %v1954_v43 = vadd.f32 %v1952_v42, %v2315_v15 }
0x24ed   :  { %v1955_v44 = vmax.f32 %v1954_v43, 0.0 }
0x24ef   :  { %2120 = vmatmul.msk.f32.vlgmr.msrb.gmra.mxu3 %vm113_vm2, %v1955_v44 }
0x2572   :  { %v1976_v45 = vpop.f32.mrf.mxu3 }
0x2573   :  { %v1977_v46 = vadd.f32 %v2781_v2, %v1976_v45 }
0x2575   :  { %v1979_v47 = vmax.f32 %v1977_v46, 0.0 }
0x2577   :  { %2121 = vmatmul.msk.f32.vlgmr.msra.gmra.mxu1 %vm113_vm2, %v1979_v47 }
0x25f4   :  { %v2000_v48 = vpop.f32.mrf.mxu1 }
0x25f5   :  { %v2001_v49 = vadd.f32 %v2789_v50, %v2000_v48 }
0x25f7   :  { %v2004_v52 = vmul.f32 0.0070720087, %v2001_v49 }
0x25f9   :  { %v2005_v15 = vsub.f32 %v2003_v51, %v2004_v52 }
0x25fb   :  { %v2008_v2 = vadd.f32 %v2122_v53, %v2005_v15 }
0x25fd   :  { %2010 = vst.msk [vmem:[#allocation2] sm:$0x3] %vm2009_vm3, %v2008_v2 }
0x25fe   :  { %2021 = dma.vmem_to_hbm [thread:$0]  %s2017_s22, 32, %s2019_s4, [#allocation3]  }
0x25ff   :  { %2186 = dma.done.wait [#allocation3], 32  }
0x2600   :  { %2187 = vsyncadd [#allocation3], 4294967264 }
0x2601   :  { %2026 = vsyncpa [#allocation3], 1 }

</bundles_post_ra>
